<compile_context>
chip_gen: v7x
topology: tpu7x:2x2x1
jax: 0.10.0
libtpu: 0.0.40
codegen_flags: <defaults>
</compile_context>

<pallas_src>
import jax
import jax.numpy as jnp
import numpy as np
from jax.experimental import pallas as pl
from jax.experimental.pallas import tpu as pltpu

# ----------------------------- sizes -----------------------------
B, S, H = 2, 8, 32          # batch, seq, hidden
NH = 4                      # attention heads
DH = H // NH                # head dim
FF = 64                     # feed-forward width
V = 128                     # vocab size
MAXPOS = 16                 # positional-embedding table size
R = B * S                   # flattened rows
LANES = 128
LOG2S = S.bit_length() - 1
assert (1 << LOG2S) == S    # S power of two -> shift-based batch ids

# packed bias/gain slab rows (each row lane-padded to 128)
_ROW_BQKV, _ROW_BO, _ROW_B1, _ROW_B2 = 0, 1, 2, 3
_ROW_G1, _ROW_BE1, _ROW_G2, _ROW_BE2, _ROW_BLM = 4, 5, 6, 7, 8
_NVEC = 9

# packed weight slab row offsets (each matrix lane-padded to 128)
ROW_WQKV = 0
ROW_WO = ROW_WQKV + H
ROW_W1 = ROW_WO + H
ROW_W2 = ROW_W1 + H
ROW_WLM = ROW_W2 + FF
ROW_ETOK = ROW_WLM + H
ROW_EPOS = ROW_ETOK + V
W_ROWS = ROW_EPOS + MAXPOS          # 336


# ------------------------ pallas kernel ---------------------------
def _layernorm(x, g, b, eps=1e-12):
    mu = jnp.mean(x, axis=-1, keepdims=True)
    var = jnp.mean((x - mu) ** 2, axis=-1, keepdims=True)
    return (x - mu) * jax.lax.rsqrt(var + eps) * g + b


def bertlm_kernel(ids_ref, w_ref, vec_ref, logp_ref, attn_ref):
    vec = vec_ref[...]                                          # (9, 128)
    bqkv = vec[_ROW_BQKV:_ROW_BQKV + 1, 0:3 * H]
    bo   = vec[_ROW_BO:_ROW_BO + 1, 0:H]
    b1   = vec[_ROW_B1:_ROW_B1 + 1, 0:FF]
    b2   = vec[_ROW_B2:_ROW_B2 + 1, 0:H]
    g1   = vec[_ROW_G1:_ROW_G1 + 1, 0:H]
    be1  = vec[_ROW_BE1:_ROW_BE1 + 1, 0:H]
    g2   = vec[_ROW_G2:_ROW_G2 + 1, 0:H]
    be2  = vec[_ROW_BE2:_ROW_BE2 + 1, 0:H]
    blm  = vec[_ROW_BLM:_ROW_BLM + 1, 0:V]

    # ---- fused embedding lookup: exact one-hot @ table (MXU) ----
    ids = ids_ref[...]                                          # (R, 2) int32
    tok = ids[:, 0:1]
    pos = ids[:, 1:2]
    tok_oh = jnp.where(
        jax.lax.broadcasted_iota(jnp.int32, (R, V), 1) == tok, 1.0, 0.0)
    pos_oh = jnp.where(
        jax.lax.broadcasted_iota(jnp.int32, (R, MAXPOS), 1) == pos, 1.0, 0.0)
    x = (jnp.dot(tok_oh, w_ref[ROW_ETOK:ROW_ETOK + V, 0:H],
                 preferred_element_type=jnp.float32)
         + jnp.dot(pos_oh, w_ref[ROW_EPOS:ROW_EPOS + MAXPOS, 0:H],
                   preferred_element_type=jnp.float32))         # (R, H)

    # ---- fused QKV projection: one (R,H) x (H,3H) matmul ----
    qkv = jnp.dot(x, w_ref[ROW_WQKV:ROW_WQKV + H, 0:3 * H],
                  preferred_element_type=jnp.float32) + bqkv    # (R, 3H)
    # head-major stacks (layout only; all compute below is batched over NH)
    q3 = jnp.stack([qkv[:, h * DH:(h + 1) * DH]
                    for h in range(NH)], axis=0)                # (NH, R, DH)
    k3 = jnp.stack([qkv[:, H + h * DH:H + (h + 1) * DH]
                    for h in range(NH)], axis=0)
    v3 = jnp.stack([qkv[:, 2 * H + h * DH:2 * H + (h + 1) * DH]
                    for h in range(NH)], axis=0)

    # block-diagonal additive mask, built once (shift, not divide)
    rb = jax.lax.broadcasted_iota(jnp.int32, (R, R), 0) >> LOG2S
    cb = jax.lax.broadcasted_iota(jnp.int32, (R, R), 1) >> LOG2S
    mask_bias = jnp.where(rb == cb, 0.0, -1e30)                 # (R, R)

    scale = 1.0 / float(np.sqrt(DH))
    sc = jnp.einsum('hqd,hkd->hqk', q3, k3,
                    preferred_element_type=jnp.float32) * scale  # (NH, R, R)
    sc = sc + mask_bias                                          # bcast over NH
    sc = sc - jnp.max(sc, axis=-1, keepdims=True)
    p = jnp.exp(sc)
    p = p / jnp.sum(p, axis=-1, keepdims=True)                   # exact softmax

    ctx = jnp.einsum('hqk,hkd->hqd', p, v3,
                     preferred_element_type=jnp.float32)         # (NH, R, DH)
    # fold concat + output projection: sum_h ctx_h @ wo[h*DH:(h+1)*DH, :]
    wo3 = w_ref[ROW_WO:ROW_WO + H, 0:H].reshape(NH, DH, H)
    co = jnp.einsum('hqd,hdo->hqo', ctx, wo3,
                    preferred_element_type=jnp.float32)          # (NH, R, H)
    attn_out = co[0]
    for h in range(1, NH):
        attn_out = attn_out + co[h]                              # (R, H)

    # lane-dense attention-probability store: one full (NH*R, 128) vst
    attn_ref[...] = jnp.concatenate(
        [p.reshape(NH * R, R),
         jnp.zeros((NH * R, LANES - R), jnp.float32)], axis=-1)

    h1 = _layernorm(x + attn_out + bo, g1, be1)

    ff = jnp.dot(h1, w_ref[ROW_W1:ROW_W1 + H, 0:FF],
                 preferred_element_type=jnp.float32) + b1
    ff = jax.nn.gelu(ff)                                         # tanh approx
    ff = jnp.dot(ff, w_ref[ROW_W2:ROW_W2 + FF, 0:H],
                 preferred_element_type=jnp.float32) + b2
    h2 = _layernorm(h1 + ff, g2, be2)

    # ---- fused MaskedLanguageModel head: Linear + LogSoftmax ----
    logits = jnp.dot(h2, w_ref[ROW_WLM:ROW_WLM + H, 0:V],
                     preferred_element_type=jnp.float32) + blm
    z = logits - jnp.max(logits, axis=-1, keepdims=True)
    logp_ref[...] = z - jnp.log(jnp.sum(jnp.exp(z), axis=-1, keepdims=True))


# --------------------------- wrapper -------------------------------
def _pad_lanes(m, lanes=LANES):
    return jnp.pad(m, ((0, 0), (0, lanes - m.shape[1])))


def pack_params(P):
    wqkv = jnp.concatenate([P["wq"], P["wk"], P["wv"]], axis=1)      # (H, 3H)
    w_slab = jnp.concatenate([
        _pad_lanes(wqkv), _pad_lanes(P["wo"]), _pad_lanes(P["w1"]),
        _pad_lanes(P["w2"]), _pad_lanes(P["wlm"]),
        _pad_lanes(P["emb_tok"]), _pad_lanes(P["emb_pos"]),
    ], axis=0)                                                        # (336, 128)
    vec = jnp.concatenate([
        _pad_lanes(jnp.concatenate([P["bq"], P["bk"], P["bv"]], axis=1)),
        _pad_lanes(P["bo"]), _pad_lanes(P["b1"]), _pad_lanes(P["b2"]),
        _pad_lanes(P["g1"]), _pad_lanes(P["be1"]), _pad_lanes(P["g2"]),
        _pad_lanes(P["be2"]), _pad_lanes(P["blm"]),
    ], axis=0)                                                        # (9, 128)
    return w_slab, vec


def bertlm_forward(tok_ids, pos_ids, P):
    w_slab, vec = pack_params(P)
    ids = jnp.stack([tok_ids.reshape(R), pos_ids.reshape(R)],
                    axis=1).astype(jnp.int32)                         # (R, 2)

    full = lambda shp: pl.BlockSpec(shp, lambda i: (0,) * len(shp))
    cost = pl.CostEstimate(
        flops=2 * R * (V * H + MAXPOS * H + H * 3 * H + H * FF + FF * H + H * V)
              + 2 * NH * R * (2 * R * DH + DH * H),
        transcendentals=NH * R * R + R * (V + FF + 4),
        bytes_accessed=4 * (W_ROWS * LANES + _NVEC * LANES + 2 * R
                            + R * V + NH * R * LANES))

    logp_flat, attn_dense = pl.pallas_call(
        bertlm_kernel,
        grid=(1,),
        in_specs=[full(ids.shape), full(w_slab.shape), full(vec.shape)],
        out_specs=(full((R, V)), full((NH * R, LANES))),
        out_shape=(jax.ShapeDtypeStruct((R, V), jnp.float32),
                   jax.ShapeDtypeStruct((NH * R, LANES), jnp.float32)),
        compiler_params=pltpu.CompilerParams(
            dimension_semantics=("arbitrary",)),
        cost_estimate=cost,
    )(ids, w_slab, vec)

    # unpack attention probs -> (B, NH, S, S)  (attn_list analogue)
    attn_p = attn_dense[:, :R].reshape(NH, B, S, B, S)
    attn = jnp.stack([attn_p[:, b, :, b, :] for b in range(B)], axis=0)
    return logp_flat.reshape(B, S, V), attn


# --------------------- pure-JAX reference --------------------------
def ref_forward(tok_ids, pos_ids, P):
    e = P["emb_tok"][tok_ids] + P["emb_pos"][pos_ids]
    q = e @ P["wq"] + P["bq"]
    k = e @ P["wk"] + P["bk"]
    v = e @ P["wv"] + P["bv"]
    qh = q.reshape(B, S, NH, DH).transpose(0, 2, 1, 3)
    kh = k.reshape(B, S, NH, DH).transpose(0, 2, 1, 3)
    vh = v.reshape(B, S, NH, DH).transpose(0, 2, 1, 3)
    sc = jnp.einsum("bhqd,bhkd->bhqk", qh, kh) / float(np.sqrt(DH))
    p = jax.nn.softmax(sc, axis=-1)
    ctx = jnp.einsum("bhqk,bhkd->bhqd", p, vh).transpose(0, 2, 1, 3).reshape(B, S, H)
    attn_out = ctx @ P["wo"] + P["bo"]
    h1 = _layernorm(e + attn_out, P["g1"], P["be1"])
    ff = jax.nn.gelu(h1 @ P["w1"] + P["b1"]) @ P["w2"] + P["b2"]
    out = _layernorm(h1 + ff, P["g2"], P["be2"])
    logits = out @ P["wlm"] + P["blm"]
    return jax.nn.log_softmax(logits, axis=-1), p


# --------------------------- params --------------------------------
def xavier_uniform(key, shape):
    fan_in, fan_out = shape
    limit = np.sqrt(6.0 / (fan_in + fan_out))
    return jax.random.uniform(key, shape, jnp.float32, -limit, limit)


def init_params(key):
    ks = jax.random.split(key, 12)
    return {
        "emb_tok": jax.random.normal(ks[0], (V, H), jnp.float32),
        "emb_pos": jax.random.normal(ks[1], (MAXPOS, H), jnp.float32),
        "wq": xavier_uniform(ks[2], (H, H)), "bq": jnp.zeros((1, H), jnp.float32),
        "wk": xavier_uniform(ks[3], (H, H)), "bk": jnp.zeros((1, H), jnp.float32),
        "wv": xavier_uniform(ks[4], (H, H)), "bv": jnp.zeros((1, H), jnp.float32),
        "wo": xavier_uniform(ks[5], (H, H)), "bo": jnp.zeros((1, H), jnp.float32),
        "w1": xavier_uniform(ks[6], (H, FF)), "b1": jnp.zeros((1, FF), jnp.float32),
        "w2": xavier_uniform(ks[7], (FF, H)), "b2": jnp.zeros((1, H), jnp.float32),
        "g1": jnp.ones((1, H), jnp.float32), "be1": jnp.zeros((1, H), jnp.float32),
        "g2": jnp.ones((1, H), jnp.float32), "be2": jnp.zeros((1, H), jnp.float32),
        "wlm": xavier_uniform(ks[8], (H, V)), "blm": jnp.zeros((1, V), jnp.float32),
    }


# ----------------------------- main ---------------------------------
if __name__ == "__main__":
    key = jax.random.PRNGKey(0)
    kp, kx = jax.random.split(key)
    P = init_params(kp)

    tok_ids = jax.random.randint(kx, (B, S), 0, V, dtype=jnp.int32)
    pos_ids = jnp.broadcast_to(jnp.arange(S, dtype=jnp.int32), (B, S))

    logp, attn = bertlm_forward(tok_ids, pos_ids, P)
    jax.block_until_ready((logp, attn))

    logp_ref, attn_probs_ref = ref_forward(tok_ids, pos_ids, P)
    np.testing.assert_allclose(np.asarray(attn), np.asarray(attn_probs_ref),
                               rtol=1e-2, atol=1e-2)
    np.testing.assert_allclose(np.asarray(logp), np.asarray(logp_ref),
                               rtol=1e-2, atol=1e-2)

    print("KERNEL_OK")
</pallas_src>

<mosaic_0001>
module attributes {stable_mosaic.version = 11 : i64} {
  func.func @bertlm_kernel(%arg0: i32, %arg1: memref<16x2xi32, #tpu.memory_space<vmem>>, %arg2: memref<336x128xf32, #tpu.memory_space<vmem>>, %arg3: memref<9x128xf32, #tpu.memory_space<vmem>>, %arg4: memref<16x128xf32, #tpu.memory_space<vmem>>, %arg5: memref<64x128xf32, #tpu.memory_space<vmem>>) attributes {dimension_semantics = [#tpu.dimension_semantics<arbitrary>], iteration_bounds = array<i64: 1>, scalar_prefetch = 0 : i64, scratch_operands = 0 : i64, tpu.core_type = #tpu.core_type<tc>, window_params = [{pipeline_mode = #tpu.pipeline_mode<synchronous>, transform_indices = @transform_0, window_bounds = array<i64: 16, 2>}, {pipeline_mode = #tpu.pipeline_mode<synchronous>, transform_indices = @transform_1, window_bounds = array<i64: 336, 128>}, {pipeline_mode = #tpu.pipeline_mode<synchronous>, transform_indices = @transform_2, window_bounds = array<i64: 9, 128>}, {pipeline_mode = #tpu.pipeline_mode<synchronous>, transform_indices = @transform_3, window_bounds = array<i64: 16, 128>}, {pipeline_mode = #tpu.pipeline_mode<synchronous>, transform_indices = @transform_4, window_bounds = array<i64: 64, 128>}]} {
    %c0 = arith.constant 0 : index
    %c0_0 = arith.constant 0 : index
    %0 = vector.load %arg3[%c0, %c0_0] : memref<9x128xf32, #tpu.memory_space<vmem>>, vector<9x128xf32>
    %1 = vector.extract_strided_slice %0 {offsets = [0, 0], sizes = [1, 96], strides = [1, 1]} : vector<9x128xf32> to vector<1x96xf32>
    %2 = vector.extract_strided_slice %0 {offsets = [1, 0], sizes = [1, 32], strides = [1, 1]} : vector<9x128xf32> to vector<1x32xf32>
    %3 = vector.extract_strided_slice %0 {offsets = [2, 0], sizes = [1, 64], strides = [1, 1]} : vector<9x128xf32> to vector<1x64xf32>
    %4 = vector.extract_strided_slice %0 {offsets = [3, 0], sizes = [1, 32], strides = [1, 1]} : vector<9x128xf32> to vector<1x32xf32>
    %5 = vector.extract_strided_slice %0 {offsets = [4, 0], sizes = [1, 32], strides = [1, 1]} : vector<9x128xf32> to vector<1x32xf32>
    %6 = vector.extract_strided_slice %0 {offsets = [5, 0], sizes = [1, 32], strides = [1, 1]} : vector<9x128xf32> to vector<1x32xf32>
    %7 = vector.extract_strided_slice %0 {offsets = [6, 0], sizes = [1, 32], strides = [1, 1]} : vector<9x128xf32> to vector<1x32xf32>
    %8 = vector.extract_strided_slice %0 {offsets = [7, 0], sizes = [1, 32], strides = [1, 1]} : vector<9x128xf32> to vector<1x32xf32>
    %9 = vector.extract_strided_slice %0 {offsets = [8, 0], sizes = [1, 128], strides = [1, 1]} : vector<9x128xf32> to vector<1x128xf32>
    %c0_1 = arith.constant 0 : index
    %c0_2 = arith.constant 0 : index
    %10 = vector.load %arg1[%c0_1, %c0_2] : memref<16x2xi32, #tpu.memory_space<vmem>>, vector<16x2xi32>
    %11 = vector.extract_strided_slice %10 {offsets = [0, 0], sizes = [16, 1], strides = [1, 1]} : vector<16x2xi32> to vector<16x1xi32>
    %12 = vector.extract_strided_slice %10 {offsets = [0, 1], sizes = [16, 1], strides = [1, 1]} : vector<16x2xi32> to vector<16x1xi32>
    %13 = tpu.iota {dimensions = array<i32: 1>} : vector<16x128xi32>
    %14 = vector.broadcast %11 : vector<16x1xi32> to vector<16x128xi32>
    %15 = arith.cmpi eq, %13, %14 : vector<16x128xi32>
    %cst = arith.constant 1.000000e+00 : f32
    %cst_3 = arith.constant 0.000000e+00 : f32
    %16 = vector.broadcast %cst : f32 to vector<16x128xf32>
    %17 = vector.broadcast %cst_3 : f32 to vector<16x128xf32>
    %18 = arith.select %15, %16, %17 : vector<16x128xi1>, vector<16x128xf32>
    %19 = tpu.iota {dimensions = array<i32: 1>} : vector<16x16xi32>
    %20 = vector.broadcast %12 : vector<16x1xi32> to vector<16x16xi32>
    %21 = arith.cmpi eq, %19, %20 : vector<16x16xi32>
    %cst_4 = arith.constant 1.000000e+00 : f32
    %cst_5 = arith.constant 0.000000e+00 : f32
    %22 = vector.broadcast %cst_4 : f32 to vector<16x16xf32>
    %23 = vector.broadcast %cst_5 : f32 to vector<16x16xf32>
    %24 = arith.select %21, %22, %23 : vector<16x16xi1>, vector<16x16xf32>
    %c192 = arith.constant 192 : index
    %c0_6 = arith.constant 0 : index
    %25 = vector.load %arg2[%c192, %c0_6] : memref<336x128xf32, #tpu.memory_space<vmem>>, vector<128x32xf32>
    %cst_7 = arith.constant dense<0.000000e+00> : vector<16x32xf32>
    %26 = tpu.matmul %18, %25, %cst_7 {dimension_numbers = #tpu.dot_dimension_numbers<[1], [0], [0], [1], [0, 0, 1, 1], [], []>} : vector<16x128xf32>, vector<128x32xf32>, vector<16x32xf32> -> vector<16x32xf32>
    %c320 = arith.constant 320 : index
    %c0_8 = arith.constant 0 : index
    %27 = vector.load %arg2[%c320, %c0_8] : memref<336x128xf32, #tpu.memory_space<vmem>>, vector<16x32xf32>
    %cst_9 = arith.constant dense<0.000000e+00> : vector<16x32xf32>
    %28 = tpu.matmul %24, %27, %cst_9 {dimension_numbers = #tpu.dot_dimension_numbers<[1], [0], [0], [1], [0, 0, 1, 1], [], []>} : vector<16x16xf32>, vector<16x32xf32>, vector<16x32xf32> -> vector<16x32xf32>
    %29 = arith.addf %26, %28 : vector<16x32xf32>
    %c0_10 = arith.constant 0 : index
    %c0_11 = arith.constant 0 : index
    %30 = vector.load %arg2[%c0_10, %c0_11] : memref<336x128xf32, #tpu.memory_space<vmem>>, vector<32x96xf32>
    %cst_12 = arith.constant dense<0.000000e+00> : vector<16x96xf32>
    %31 = tpu.matmul %29, %30, %cst_12 {dimension_numbers = #tpu.dot_dimension_numbers<[1], [0], [0], [1], [0, 0, 1, 1], [], []>} : vector<16x32xf32>, vector<32x96xf32>, vector<16x96xf32> -> vector<16x96xf32>
    %32 = vector.broadcast %1 : vector<1x96xf32> to vector<16x96xf32>
    %33 = arith.addf %31, %32 : vector<16x96xf32>
    %34 = vector.extract_strided_slice %33 {offsets = [0, 0], sizes = [16, 8], strides = [1, 1]} : vector<16x96xf32> to vector<16x8xf32>
    %35 = vector.extract_strided_slice %33 {offsets = [0, 8], sizes = [16, 8], strides = [1, 1]} : vector<16x96xf32> to vector<16x8xf32>
    %36 = vector.extract_strided_slice %33 {offsets = [0, 16], sizes = [16, 8], strides = [1, 1]} : vector<16x96xf32> to vector<16x8xf32>
    %37 = vector.extract_strided_slice %33 {offsets = [0, 24], sizes = [16, 8], strides = [1, 1]} : vector<16x96xf32> to vector<16x8xf32>
    %38 = vector.shape_cast %34 : vector<16x8xf32> to vector<1x16x8xf32>
    %39 = vector.shape_cast %35 : vector<16x8xf32> to vector<1x16x8xf32>
    %40 = vector.shape_cast %36 : vector<16x8xf32> to vector<1x16x8xf32>
    %41 = vector.shape_cast %37 : vector<16x8xf32> to vector<1x16x8xf32>
    %42 = tpu.concatenate %38, %39, %40, %41 in 0 : vector<1x16x8xf32>, vector<1x16x8xf32>, vector<1x16x8xf32>, vector<1x16x8xf32> -> vector<4x16x8xf32>
    %43 = vector.extract_strided_slice %33 {offsets = [0, 32], sizes = [16, 8], strides = [1, 1]} : vector<16x96xf32> to vector<16x8xf32>
    %44 = vector.extract_strided_slice %33 {offsets = [0, 40], sizes = [16, 8], strides = [1, 1]} : vector<16x96xf32> to vector<16x8xf32>
    %45 = vector.extract_strided_slice %33 {offsets = [0, 48], sizes = [16, 8], strides = [1, 1]} : vector<16x96xf32> to vector<16x8xf32>
    %46 = vector.extract_strided_slice %33 {offsets = [0, 56], sizes = [16, 8], strides = [1, 1]} : vector<16x96xf32> to vector<16x8xf32>
    %47 = vector.shape_cast %43 : vector<16x8xf32> to vector<1x16x8xf32>
    %48 = vector.shape_cast %44 : vector<16x8xf32> to vector<1x16x8xf32>
    %49 = vector.shape_cast %45 : vector<16x8xf32> to vector<1x16x8xf32>
    %50 = vector.shape_cast %46 : vector<16x8xf32> to vector<1x16x8xf32>
    %51 = tpu.concatenate %47, %48, %49, %50 in 0 : vector<1x16x8xf32>, vector<1x16x8xf32>, vector<1x16x8xf32>, vector<1x16x8xf32> -> vector<4x16x8xf32>
    %52 = vector.extract_strided_slice %33 {offsets = [0, 64], sizes = [16, 8], strides = [1, 1]} : vector<16x96xf32> to vector<16x8xf32>
    %53 = vector.extract_strided_slice %33 {offsets = [0, 72], sizes = [16, 8], strides = [1, 1]} : vector<16x96xf32> to vector<16x8xf32>
    %54 = vector.extract_strided_slice %33 {offsets = [0, 80], sizes = [16, 8], strides = [1, 1]} : vector<16x96xf32> to vector<16x8xf32>
    %55 = vector.extract_strided_slice %33 {offsets = [0, 88], sizes = [16, 8], strides = [1, 1]} : vector<16x96xf32> to vector<16x8xf32>
    %56 = vector.shape_cast %52 : vector<16x8xf32> to vector<1x16x8xf32>
    %57 = vector.shape_cast %53 : vector<16x8xf32> to vector<1x16x8xf32>
    %58 = vector.shape_cast %54 : vector<16x8xf32> to vector<1x16x8xf32>
    %59 = vector.shape_cast %55 : vector<16x8xf32> to vector<1x16x8xf32>
    %60 = tpu.concatenate %56, %57, %58, %59 in 0 : vector<1x16x8xf32>, vector<1x16x8xf32>, vector<1x16x8xf32>, vector<1x16x8xf32> -> vector<4x16x8xf32>
    %61 = tpu.iota {dimensions = array<i32: 0>} : vector<16x16xi32>
    %c3_i32 = arith.constant 3 : i32
    %62 = vector.broadcast %c3_i32 : i32 to vector<16x16xi32>
    %63 = arith.shrsi %61, %62 : vector<16x16xi32>
    %64 = tpu.iota {dimensions = array<i32: 1>} : vector<16x16xi32>
    %c3_i32_13 = arith.constant 3 : i32
    %65 = vector.broadcast %c3_i32_13 : i32 to vector<16x16xi32>
    %66 = arith.shrsi %64, %65 : vector<16x16xi32>
    %67 = arith.cmpi eq, %63, %66 : vector<16x16xi32>
    %cst_14 = arith.constant 0.000000e+00 : f32
    %cst_15 = arith.constant -1.000000e+30 : f32
    %68 = vector.broadcast %cst_14 : f32 to vector<16x16xf32>
    %69 = vector.broadcast %cst_15 : f32 to vector<16x16xf32>
    %70 = arith.select %67, %68, %69 : vector<16x16xi1>, vector<16x16xf32>
    "tpu.trace_start"() <{level = 10 : i32, message = "hqd,hkd->hqk"}> : () -> ()
    %cst_16 = arith.constant dense<0.000000e+00> : vector<4x16x16xf32>
    %71 = tpu.matmul %42, %51, %cst_16 {dimension_numbers = #tpu.dot_dimension_numbers<[2], [2], [1], [1], [0, 0, 0, 1, 1, 1], [0], [0]>} : vector<4x16x8xf32>, vector<4x16x8xf32>, vector<4x16x16xf32> -> vector<4x16x16xf32>
    "tpu.trace_stop"() : () -> ()
    %cst_17 = arith.constant 0.353553385 : f32
    %72 = vector.broadcast %cst_17 : f32 to vector<4x16x16xf32>
    %73 = arith.mulf %71, %72 : vector<4x16x16xf32>
    %74 = vector.shape_cast %70 : vector<16x16xf32> to vector<1x16x16xf32>
    %75 = vector.broadcast %74 : vector<1x16x16xf32> to vector<4x16x16xf32>
    %76 = arith.addf %73, %75 : vector<4x16x16xf32>
    %cst_18 = arith.constant dense<0xFF800000> : vector<4x16xf32>
    %77 = vector.multi_reduction <maximumf>, %76, %cst_18 [2] : vector<4x16x16xf32> to vector<4x16xf32>
    %78 = vector.shape_cast %77 : vector<4x16xf32> to vector<4x16x1xf32>
    %79 = vector.broadcast %78 : vector<4x16x1xf32> to vector<4x16x16xf32>
    %80 = arith.subf %76, %79 : vector<4x16x16xf32>
    %81 = math.exp %80 : vector<4x16x16xf32>
    %cst_19 = arith.constant dense<0.000000e+00> : vector<4x16xf32>
    %82 = vector.multi_reduction <add>, %81, %cst_19 [2] : vector<4x16x16xf32> to vector<4x16xf32>
    %83 = vector.shape_cast %82 : vector<4x16xf32> to vector<4x16x1xf32>
    %84 = vector.broadcast %83 : vector<4x16x1xf32> to vector<4x16x16xf32>
    %85 = arith.divf %81, %84 : vector<4x16x16xf32>
    "tpu.trace_start"() <{level = 10 : i32, message = "hqk,hkd->hqd"}> : () -> ()
    %cst_20 = arith.constant dense<0.000000e+00> : vector<4x16x8xf32>
    %86 = tpu.matmul %85, %60, %cst_20 {dimension_numbers = #tpu.dot_dimension_numbers<[2], [1], [1], [2], [0, 0, 0, 1, 1, 2], [0], [0]>} : vector<4x16x16xf32>, vector<4x16x8xf32>, vector<4x16x8xf32> -> vector<4x16x8xf32>
    "tpu.trace_stop"() : () -> ()
    %c32 = arith.constant 32 : index
    %c0_21 = arith.constant 0 : index
    %87 = vector.load %arg2[%c32, %c0_21] : memref<336x128xf32, #tpu.memory_space<vmem>>, vector<32x32xf32>
    %88 = vector.shape_cast %87 : vector<32x32xf32> to vector<4x8x32xf32>
    "tpu.trace_start"() <{level = 10 : i32, message = "hqd,hdo->hqo"}> : () -> ()
    %cst_22 = arith.constant dense<0.000000e+00> : vector<4x16x32xf32>
    %89 = tpu.matmul %86, %88, %cst_22 {dimension_numbers = #tpu.dot_dimension_numbers<[2], [1], [1], [2], [0, 0, 0, 1, 1, 2], [0], [0]>} : vector<4x16x8xf32>, vector<4x8x32xf32>, vector<4x16x32xf32> -> vector<4x16x32xf32>
    "tpu.trace_stop"() : () -> ()
    %90 = vector.extract_strided_slice %89 {offsets = [0, 0, 0], sizes = [1, 16, 32], strides = [1, 1, 1]} : vector<4x16x32xf32> to vector<1x16x32xf32>
    %91 = vector.shape_cast %90 : vector<1x16x32xf32> to vector<16x32xf32>
    %92 = vector.extract_strided_slice %89 {offsets = [1, 0, 0], sizes = [1, 16, 32], strides = [1, 1, 1]} : vector<4x16x32xf32> to vector<1x16x32xf32>
    %93 = vector.shape_cast %92 : vector<1x16x32xf32> to vector<16x32xf32>
    %94 = arith.addf %91, %93 : vector<16x32xf32>
    %95 = vector.extract_strided_slice %89 {offsets = [2, 0, 0], sizes = [1, 16, 32], strides = [1, 1, 1]} : vector<4x16x32xf32> to vector<1x16x32xf32>
    %96 = vector.shape_cast %95 : vector<1x16x32xf32> to vector<16x32xf32>
    %97 = arith.addf %94, %96 : vector<16x32xf32>
    %98 = vector.extract_strided_slice %89 {offsets = [3, 0, 0], sizes = [1, 16, 32], strides = [1, 1, 1]} : vector<4x16x32xf32> to vector<1x16x32xf32>
    %99 = vector.shape_cast %98 : vector<1x16x32xf32> to vector<16x32xf32>
    %100 = arith.addf %97, %99 : vector<16x32xf32>
    %101 = vector.shape_cast %85 : vector<4x16x16xf32> to vector<64x16xf32>
    %cst_23 = arith.constant 0.000000e+00 : f32
    %102 = vector.broadcast %cst_23 : f32 to vector<64x112xf32>
    %103 = tpu.concatenate %101, %102 in 1 : vector<64x16xf32>, vector<64x112xf32> -> vector<64x128xf32>
    %c0_24 = arith.constant 0 : index
    %c0_25 = arith.constant 0 : index
    %104 = vector.load %arg5[%c0_24, %c0_25] : memref<64x128xf32, #tpu.memory_space<vmem>>, vector<64x128xf32>
    tpu.vector_store %arg5[%c0_24, %c0_25], %103 {strides = array<i32>} : memref<64x128xf32, #tpu.memory_space<vmem>>, vector<64x128xf32>,
    %105 = arith.addf %29, %100 : vector<16x32xf32>
    %106 = vector.broadcast %2 : vector<1x32xf32> to vector<16x32xf32>
    %107 = arith.addf %105, %106 : vector<16x32xf32>
    %cst_26 = arith.constant dense<0.000000e+00> : vector<16xf32>
    %108 = vector.multi_reduction <add>, %107, %cst_26 [1] : vector<16x32xf32> to vector<16xf32>
    %109 = vector.shape_cast %108 : vector<16xf32> to vector<16x1xf32>
    %cst_27 = arith.constant 3.200000e+01 : f32
    %110 = vector.broadcast %cst_27 : f32 to vector<16x1xf32>
    %111 = arith.divf %109, %110 : vector<16x1xf32>
    %112 = vector.broadcast %111 : vector<16x1xf32> to vector<16x32xf32>
    %113 = arith.subf %107, %112 : vector<16x32xf32>
    %114 = arith.mulf %113, %113 : vector<16x32xf32>
    %cst_28 = arith.constant dense<0.000000e+00> : vector<16xf32>
    %115 = vector.multi_reduction <add>, %114, %cst_28 [1] : vector<16x32xf32> to vector<16xf32>
    %116 = vector.shape_cast %115 : vector<16xf32> to vector<16x1xf32>
    %cst_29 = arith.constant 3.200000e+01 : f32
    %117 = vector.broadcast %cst_29 : f32 to vector<16x1xf32>
    %118 = arith.divf %116, %117 : vector<16x1xf32>
    %119 = vector.broadcast %111 : vector<16x1xf32> to vector<16x32xf32>
    %120 = arith.subf %107, %119 : vector<16x32xf32>
    %cst_30 = arith.constant 9.99999996E-13 : f32
    %121 = vector.broadcast %cst_30 : f32 to vector<16x1xf32>
    %122 = arith.addf %118, %121 : vector<16x1xf32>
    %123 = math.rsqrt %122 : vector<16x1xf32>
    %124 = vector.broadcast %123 : vector<16x1xf32> to vector<16x32xf32>
    %125 = arith.mulf %120, %124 : vector<16x32xf32>
    %126 = vector.broadcast %5 : vector<1x32xf32> to vector<16x32xf32>
    %127 = arith.mulf %125, %126 : vector<16x32xf32>
    %128 = vector.broadcast %6 : vector<1x32xf32> to vector<16x32xf32>
    %129 = arith.addf %127, %128 : vector<16x32xf32>
    %c64 = arith.constant 64 : index
    %c0_31 = arith.constant 0 : index
    %130 = vector.load %arg2[%c64, %c0_31] : memref<336x128xf32, #tpu.memory_space<vmem>>, vector<32x64xf32>
    %cst_32 = arith.constant dense<0.000000e+00> : vector<16x64xf32>
    %131 = tpu.matmul %129, %130, %cst_32 {dimension_numbers = #tpu.dot_dimension_numbers<[1], [0], [0], [1], [0, 0, 1, 1], [], []>} : vector<16x32xf32>, vector<32x64xf32>, vector<16x64xf32> -> vector<16x64xf32>
    %132 = vector.broadcast %3 : vector<1x64xf32> to vector<16x64xf32>
    %133 = arith.addf %131, %132 : vector<16x64xf32>
    %134 = arith.mulf %133, %133 : vector<16x64xf32>
    %135 = arith.mulf %133, %134 : vector<16x64xf32>
    %cst_33 = arith.constant 4.471500e-02 : f32
    %136 = vector.broadcast %cst_33 : f32 to vector<16x64xf32>
    %137 = arith.mulf %136, %135 : vector<16x64xf32>
    %138 = arith.addf %133, %137 : vector<16x64xf32>
    %cst_34 = arith.constant 0.797884583 : f32
    %139 = vector.broadcast %cst_34 : f32 to vector<16x64xf32>
    %140 = arith.mulf %139, %138 : vector<16x64xf32>
    %141 = math.tanh %140 : vector<16x64xf32>
    %cst_35 = arith.constant 1.000000e+00 : f32
    %142 = vector.broadcast %cst_35 : f32 to vector<16x64xf32>
    %143 = arith.addf %142, %141 : vector<16x64xf32>
    %cst_36 = arith.constant 5.000000e-01 : f32
    %144 = vector.broadcast %cst_36 : f32 to vector<16x64xf32>
    %145 = arith.mulf %144, %143 : vector<16x64xf32>
    %146 = arith.mulf %133, %145 : vector<16x64xf32>
    %c96 = arith.constant 96 : index
    %c0_37 = arith.constant 0 : index
    %147 = vector.load %arg2[%c96, %c0_37] : memref<336x128xf32, #tpu.memory_space<vmem>>, vector<64x32xf32>
    %cst_38 = arith.constant dense<0.000000e+00> : vector<16x32xf32>
    %148 = tpu.matmul %146, %147, %cst_38 {dimension_numbers = #tpu.dot_dimension_numbers<[1], [0], [0], [1], [0, 0, 1, 1], [], []>} : vector<16x64xf32>, vector<64x32xf32>, vector<16x32xf32> -> vector<16x32xf32>
    %149 = vector.broadcast %4 : vector<1x32xf32> to vector<16x32xf32>
    %150 = arith.addf %148, %149 : vector<16x32xf32>
    %151 = arith.addf %129, %150 : vector<16x32xf32>
    %cst_39 = arith.constant dense<0.000000e+00> : vector<16xf32>
    %152 = vector.multi_reduction <add>, %151, %cst_39 [1] : vector<16x32xf32> to vector<16xf32>
    %153 = vector.shape_cast %152 : vector<16xf32> to vector<16x1xf32>
    %cst_40 = arith.constant 3.200000e+01 : f32
    %154 = vector.broadcast %cst_40 : f32 to vector<16x1xf32>
    %155 = arith.divf %153, %154 : vector<16x1xf32>
    %156 = vector.broadcast %155 : vector<16x1xf32> to vector<16x32xf32>
    %157 = arith.subf %151, %156 : vector<16x32xf32>
    %158 = arith.mulf %157, %157 : vector<16x32xf32>
    %cst_41 = arith.constant dense<0.000000e+00> : vector<16xf32>
    %159 = vector.multi_reduction <add>, %158, %cst_41 [1] : vector<16x32xf32> to vector<16xf32>
    %160 = vector.shape_cast %159 : vector<16xf32> to vector<16x1xf32>
    %cst_42 = arith.constant 3.200000e+01 : f32
    %161 = vector.broadcast %cst_42 : f32 to vector<16x1xf32>
    %162 = arith.divf %160, %161 : vector<16x1xf32>
    %163 = vector.broadcast %155 : vector<16x1xf32> to vector<16x32xf32>
    %164 = arith.subf %151, %163 : vector<16x32xf32>
    %cst_43 = arith.constant 9.99999996E-13 : f32
    %165 = vector.broadcast %cst_43 : f32 to vector<16x1xf32>
    %166 = arith.addf %162, %165 : vector<16x1xf32>
    %167 = math.rsqrt %166 : vector<16x1xf32>
    %168 = vector.broadcast %167 : vector<16x1xf32> to vector<16x32xf32>
    %169 = arith.mulf %164, %168 : vector<16x32xf32>
    %170 = vector.broadcast %7 : vector<1x32xf32> to vector<16x32xf32>
    %171 = arith.mulf %169, %170 : vector<16x32xf32>
    %172 = vector.broadcast %8 : vector<1x32xf32> to vector<16x32xf32>
    %173 = arith.addf %171, %172 : vector<16x32xf32>
    %c160 = arith.constant 160 : index
    %c0_44 = arith.constant 0 : index
    %174 = vector.load %arg2[%c160, %c0_44] : memref<336x128xf32, #tpu.memory_space<vmem>>, vector<32x128xf32>
    %cst_45 = arith.constant dense<0.000000e+00> : vector<16x128xf32>
    %175 = tpu.matmul %173, %174, %cst_45 {dimension_numbers = #tpu.dot_dimension_numbers<[1], [0], [0], [1], [0, 0, 1, 1], [], []>} : vector<16x32xf32>, vector<32x128xf32>, vector<16x128xf32> -> vector<16x128xf32>
    %176 = vector.broadcast %9 : vector<1x128xf32> to vector<16x128xf32>
    %177 = arith.addf %175, %176 : vector<16x128xf32>
    %cst_46 = arith.constant dense<0xFF800000> : vector<16xf32>
    %178 = vector.multi_reduction <maximumf>, %177, %cst_46 [1] : vector<16x128xf32> to vector<16xf32>
    %179 = vector.shape_cast %178 : vector<16xf32> to vector<16x1xf32>
    %180 = vector.broadcast %179 : vector<16x1xf32> to vector<16x128xf32>
    %181 = arith.subf %177, %180 : vector<16x128xf32>
    %182 = math.exp %181 : vector<16x128xf32>
    %cst_47 = arith.constant dense<0.000000e+00> : vector<16xf32>
    %183 = vector.multi_reduction <add>, %182, %cst_47 [1] : vector<16x128xf32> to vector<16xf32>
    %184 = vector.shape_cast %183 : vector<16xf32> to vector<16x1xf32>
    %185 = math.log %184 : vector<16x1xf32>
    %186 = vector.broadcast %185 : vector<16x1xf32> to vector<16x128xf32>
    %187 = arith.subf %181, %186 : vector<16x128xf32>
    %c0_48 = arith.constant 0 : index
    %c0_49 = arith.constant 0 : index
    %188 = vector.load %arg4[%c0_48, %c0_49] : memref<16x128xf32, #tpu.memory_space<vmem>>, vector<16x128xf32>
    tpu.vector_store %arg4[%c0_48, %c0_49], %187 {strides = array<i32>} : memref<16x128xf32, #tpu.memory_space<vmem>>, vector<16x128xf32>,
    return
  }
  func.func @transform_0(%arg0: i32) -> (i32, i32) {
    %c0_i32 = arith.constant 0 : i32
    %c0_i32_0 = arith.constant 0 : i32
    %c0_i32_1 = arith.constant 0 : i32
    return %c0_i32, %c0_i32_0 : i32, i32
  }
  func.func @transform_1(%arg0: i32) -> (i32, i32) {
    %c0_i32 = arith.constant 0 : i32
    %c0_i32_0 = arith.constant 0 : i32
    %c0_i32_1 = arith.constant 0 : i32
    return %c0_i32, %c0_i32_0 : i32, i32
  }
  func.func @transform_2(%arg0: i32) -> (i32, i32) {
    %c0_i32 = arith.constant 0 : i32
    %c0_i32_0 = arith.constant 0 : i32
    %c0_i32_1 = arith.constant 0 : i32
    return %c0_i32, %c0_i32_0 : i32, i32
  }
  func.func @transform_3(%arg0: i32) -> (i32, i32) {
    %c0_i32 = arith.constant 0 : i32
    %c0_i32_0 = arith.constant 0 : i32
    %c0_i32_1 = arith.constant 0 : i32
    return %c0_i32, %c0_i32_0 : i32, i32
  }
  func.func @transform_4(%arg0: i32) -> (i32, i32) {
    %c0_i32 = arith.constant 0 : i32
    %c0_i32_0 = arith.constant 0 : i32
    %c0_i32_1 = arith.constant 0 : i32
    return %c0_i32, %c0_i32_0 : i32, i32
  }
}

</mosaic_0001>

<bundles_post_ra>
// kernel: tpu_custom_call.1
= control target key start
LH: loop header
LB: loop body
LE: loop exit
PB: predicated region body
PF: predicated region fallthrough
CT: control target
= control target key end

     0   :  { %10 = vsyncpa [#allocation3], 0  ;;  %s2800_s0 = inlined_call_operand.vmem [shape: s32[16,2], index: 0, kind: input, shape index: {}]   ;;  %s2801_s1 = inlined_call_operand.hbm [shape: f32[336,128], index: 1, kind: input, shape index: {}]   ;;  %s2802_s2 = inlined_call_operand.vmem [shape: f32[9,128], index: 2, kind: input, shape index: {}]   ;;  %s2803_s3 = inlined_call_operand.hbm [shape: f32[16,128], index: 3, kind: output, shape index: {0}]   ;;  %s2804_s4 = inlined_call_operand.hbm [shape: f32[64,128], index: 4, kind: output, shape index: {1}]  }
   0x1   :  { %11 = vsyncpa [#allocation4], 0 }
   0x2   :  { %12 = vsyncpa [#allocation7], 0  ;;  %s2544_s15 = smov [#allocation2]   ;;  %s2472_s19 = scalar_lea.hbm %s2801_s1, 5376 }
   0x3   :  { %s20_s16 = sshll.u32 %s2544_s15, 4  ;;  %p2473_p0 = scmp.ne.s32.totalorder %s2801_s1, %s2472_s19  ;;  %s21_s16 = int_to_ptr.vmem [resolvable:$true] %s20_s16 }
   0x4   :  { %p2476_p1 = scmp.lt.u32.totalorder %s2472_s19, %s2801_s1 }
   0x6   :  { %p2478_p2 = pnand %p2476_p1, %p2473_p0 }
   0x8   :  { %2481 = shalt.err (!%p2478_p2)
}
   0x9   :  { %s2482_s24 = scalar_lea.vmem %s21_s16, 5376  ;;  %p2487_p4 = scmp.lt.s32.totalorder %s21_s16, %s21_s16 }
   0xa   :  { %p2483_p3 = scmp.ne.s32.totalorder %s21_s16, %s2482_s24  ;;  %p2488_p5 = scmp.lt.s32.totalorder %s2482_s24, %s2482_s24 }
   0xc   :  { %p2489_p6 = por %p2488_p5, %p2487_p4 }
   0xe   :  { %p2490_p7 = pnand %p2489_p6, %p2483_p3 }
  0x10   :  { %2493 = shalt.err (!%p2490_p7)
}
  0x11   :  { %s2545_s25 = smov 128   ;;  %s2546_s26 = smov 8  }
  0x12   :  { %26 = dma.hbm_to_vmem [thread:$0]  %s2801_s1, 5376, %s21_s16, [#allocation3], %s2545_s25, %s2545_s25, %s2546_s26  }
  0x13   :  { %2538 = dma.done.wait [#allocation3], 5376  }
  0x14   :  { %2539 = vsyncadd [#allocation3], 4294961920  ;;  %v2547_v0 = vmov 1   ;;  %v2548_v1 = vmov 0   ;;  %v34_v2 = vld [vmem:[%s2800_s0] sm:$0xff]  ;;  %v75_v4 = vld [vmem:[#allocation2 + $0x148] sm:$0xff]  ;;  %v36_v16 = vlaneseq }
  0x15   :  { %2378 = vset.pattern.permute.xlu0 %v2547_v0  ;;  %2379 = vset.pattern.permute.xlu1 %v2548_v1  ;;  %v74_v3 = vld [vmem:[#allocation2 + $0x140] sm:$0xff]  ;;  %v35_v5 = vld [vmem:[%s2800_s0 + $0x8] sm:$0xff]  ;;  %v235_v12 = vld [vmem:[#allocation2 + $0x10] sm:$0xff]  ;;  %vm76_vm0 = vcmask 130048   ;;  %v2549_v19 = vmov 0.0   ;;  %v2550_v29 = vmov 1.0  }
  0x16   :  { %49 = vperm.xlu0 %2378, %v34_v2   ;;  %39 = vperm.xlu1 %2379, %v34_v2   ;;  %v2239_v6 = vpack.c.bf16 %v75_v4, %v74_v3  ;;  %v58_v7 = vld [vmem:[#allocation2 + $0xc0] sm:$0xff]  ;;  %v59_v8 = vld [vmem:[#allocation2 + $0xc8] sm:$0xff]  ;;  %v236_v14 = vld [vmem:[#allocation2 + $0x18] sm:$0xff]  ;;  %v2605_v17 = vand.u32 127, %v36_v16  ;;  %vm241_vm5 = vcmask 261120   ;;  %v2621_v49 = vshrl.u32 %v36_v16, 7 }
  0x17   :  { %v2243_v9 = vpack.c.bf16 %v59_v8, %v58_v7  ;;  %v233_v10 = vld [vmem:[#allocation2] sm:$0xff]  ;;  %v234_v11 = vld [vmem:[#allocation2 + $0x8] sm:$0xff]  ;;  %v2279_v15 = vpack.c.bf16 %v236_v14, %v235_v12  ;;  %v60_v21 = vld [vmem:[#allocation2 + $0xd0] sm:$0xff]  ;;  %vm351_vm6 = vcmask 64512   ;;  %s2551_s7 = smov 120   ;;  %s2552_s8 = smov 112  }
  0x18   :  { %2240 = vmatprep.subr.bf16.mxu0 %v2239_v6  ;;  %v2275_v13 = vpack.c.bf16 %v234_v11, %v233_v10  ;;  %v61_v22 = vld [vmem:[#allocation2 + $0xd8] sm:$0xff]  ;;  %v62_v27 = vld [vmem:[#allocation2 + $0xe0] sm:$0xff]  ;;  %v63_v28 = vld [vmem:[#allocation2 + $0xe8] sm:$0xff]  ;;  %v239_v50 = vsub.s32 0, %v2621_v49  ;;  %s2553_s9 = smov 104   ;;  %s2554_s10 = smov 96  }
  0x19   :  { %2242 = vmatpush3.bf16.msra.mxu0 %v2239_v6  ;;  %v2247_v25 = vpack.c.bf16 %v61_v22, %v60_v21  ;;  %v2251_v30 = vpack.c.bf16 %v63_v28, %v62_v27  ;;  %v64_v31 = vld [vmem:[#allocation2 + $0xf0] sm:$0xff]  ;;  %v65_v32 = vld [vmem:[#allocation2 + $0xf8] sm:$0xff]  ;;  %v66_v34 = vld [vmem:[#allocation2 + $0x100] sm:$0xff]  ;;  %v339_v21 = vadd.s32 8, %v2621_v49  ;;  %s2556_s11 = smov 64   ;;  %vm1664_vm10 = vcmask 523264  }
  0x1a   :  { %52 = vperm.xlu0 %2378, %v35_v5   ;;  %42 = vperm.xlu1 %2379, %v35_v5   ;;  %v2255_v33 = vpack.c.bf16 %v65_v32, %v64_v31  ;;  %v67_v35 = vld [vmem:[#allocation2 + $0x108] sm:$0xff]  ;;  %v68_v37 = vld [vmem:[#allocation2 + $0x110] sm:$0xff]  ;;  %v69_v38 = vld [vmem:[#allocation2 + $0x118] sm:$0xff]  ;;  %s2557_s14 = smov [#allocation6]  }
  0x1b   :  { %2244 = vmatprep.subr.bf16.mxu0 %v2243_v9  ;;  %2276 = vmatprep.subr.bf16.mxu1 %v2275_v13  ;;  %v2259_v36 = vpack.c.bf16 %v67_v35, %v66_v34  ;;  %v2263_v39 = vpack.c.bf16 %v69_v38, %v68_v37  ;;  %v70_v40 = vld [vmem:[#allocation2 + $0x120] sm:$0xff]  ;;  %v71_v41 = vld [vmem:[#allocation2 + $0x128] sm:$0xff]  ;;  %v72_v43 = vld [vmem:[#allocation2 + $0x130] sm:$0xff]  ;;  %v341_v22 = vshra.s32 %v339_v21, 3 }
  0x1c   :  { %2278 = vmatpush3.bf16.msra.mxu1 %v2275_v13  ;;  %v2267_v42 = vpack.c.bf16 %v71_v41, %v70_v40  ;;  %v73_v44 = vld [vmem:[#allocation2 + $0x138] sm:$0xff]  ;;  %v2627_v51 = vld [vmem:[%s2802_s2] sm:$0xff]  ;;  %vm2645_vm7 = vmpackc.low %vm351_vm6, %vm351_vm6 }
  0x1d   :  { %2280 = vmatprep.subr.bf16.mxu1 %v2279_v15  ;;  %v2271_v45 = vpack.c.bf16 %v73_v44, %v72_v43  ;;  %v240_v52 = vrot.slane %v2627_v51, %v239_v50 }
  0x20   :  { %2282 = vmatpush3.bf16.msra.mxu1 %v2279_v15 }
  0x95   :  { %v50_v18 = vpop.permute.xlu0 %49  ;;  %v40_v24 = vpop.permute.xlu1 %39 }
  0x96   :  { %vm54_vm1 = vcmp.eq.s32.totalorder %v2605_v17, %v50_v18  ;;  %vm44_vm3 = vcmp.eq.s32.totalorder %v2605_v17, %v40_v24  ;;  %v340_v24 = vshra.s32 %v2621_v49, 3 }
  0x97   :  { %v56_v20 = vsel %vm54_vm1, 1.0, %v2549_v19 }
  0x98   :  { %2073 = vmatprep.mubr.msk.f32.mxu0 %vm76_vm0, %v56_v20 }
  0x99   :  { %v53_v23 = vpop.permute.xlu0 %52  ;;  %v43_v46 = vpop.permute.xlu1 %42 }
  0x9a   :  { %vm55_vm2 = vcmp.eq.s32.totalorder %v2605_v17, %v53_v23  ;;  %vm45_vm4 = vcmp.eq.s32.totalorder %v2605_v17, %v43_v46  ;;  %v342_v23 = vshra.s32 %v2605_v17, 3 }
  0x9b   :  { %v57_v26 = vsel %vm55_vm2, 1.0, %v2549_v19 }
  0x9c   :  { %2074 = vmatmul.mubr.msk.f32.vlgmr.msra.gmra.mrb[0].mxu0 %vm76_vm0, %v57_v26  ;;  %vm344_vm8 = vcmp.eq.s32.totalorder %v341_v22, %v342_v23  ;;  %vm343_vm9 = vcmp.eq.s32.totalorder %v340_v24, %v342_v23  ;;  %v2555_v26 = vmov -1e+30  }
  0x9d   :  { %2246 = vmatpush3.bf16.msra.mxu0 %v2243_v9  ;;  %2108 = vmatprep.mubr.msk.f32.mxu0 %vm44_vm3, %v2550_v29  ;;  %v346_v27 = vsel %vm344_vm8, 0.0, %v2555_v26 }
  0x9e   :  { %2248 = vmatprep.subr.bf16.mxu0 %v2247_v25 }
  0xa1   :  { %2250 = vmatpush3.bf16.msra.mxu0 %v2247_v25 }
  0xa2   :  { %2252 = vmatprep.subr.bf16.mxu0 %v2251_v30 }
  0xa5   :  { %2254 = vmatpush3.bf16.msra.mxu0 %v2251_v30  ;;  %v345_v30 = vsel %vm343_vm9, 0.0, %v2555_v26 }
  0xa6   :  { %2256 = vmatprep.subr.bf16.mxu0 %v2255_v33 }
  0xa9   :  { %2258 = vmatpush3.bf16.msra.mxu0 %v2255_v33 }
  0xaa   :  { %2260 = vmatprep.subr.bf16.mxu0 %v2259_v36 }
  0xad   :  { %2262 = vmatpush3.bf16.msra.mxu0 %v2259_v36 }
  0xae   :  { %2264 = vmatprep.subr.bf16.mxu0 %v2263_v39 }
  0xb1   :  { %2266 = vmatpush3.bf16.msra.mxu0 %v2263_v39 }
  0xb2   :  { %2268 = vmatprep.subr.bf16.mxu0 %v2267_v42 }
  0xb5   :  { %2270 = vmatpush3.bf16.msra.mxu0 %v2267_v42 }
  0xb6   :  { %2272 = vmatprep.subr.bf16.mxu0 %v2271_v45 }
  0xb9   :  { %2274 = vmatpush3.bf16.msra.mxu0 %v2271_v45 }
  0xbc   :  { %2109 = vmatmul.mubr.msk.f32.vlgmr.msra.gmra.mrb[0].mxu0 %vm45_vm4, %v2550_v29 }
 0x18f   :  { %v2613_v47 = vpop.f32.mrb[0].mxu0 }
 0x190   :  { %v2615_v48 = vpop.f32.mrb[1].mxu0 }
 0x191   :  { %2119 = vmatprep.mubr.msk.f32.mxu1 %vm241_vm5, %v2615_v48 }
 0x192   :  { %2120 = vmatmul.mubr.msk.f32.vlgmr.msra.gmra.mrb[0].mxu1 %vm241_vm5, %v2613_v47 }
 0x265   :  { %v2121_v53 = vpop.f32.mrb[0].mxu1 }
 0x266   :  { %v320_v54 = vadd.f32 %v2121_v53, %v240_v52  ;;  %v314_v55 = vpop.f32.mrb[1].mxu1 }
 0x267   :  { %v315_v56 = vadd.f32 %v314_v55, %v240_v52 }
 0x268   :  { %327 = vrot.lane.b32.xlu1 %v320_v54, %s2551_s7 }
 0x269   :  { %325 = vrot.lane.b32.xlu0 %v315_v56, %s2551_s7  ;;  %2126 = vmatprep.mubr.msk.f32.mxu1 %vm351_vm6, %v315_v56  ;;  %v2631_v57 = vpack.i.bf16 %v320_v54, %v315_v56 }
 0x26c   :  { %331 = vrot.lane.b32.xlu1 %v320_v54, %s2552_s8 }
 0x26d   :  { %329 = vrot.lane.b32.xlu0 %v315_v56, %s2552_s8 }
 0x270   :  { %335 = vrot.lane.b32.xlu1 %v320_v54, %s2553_s9 }
 0x271   :  { %333 = vrot.lane.b32.xlu0 %v315_v56, %s2553_s9 }
 0x275   :  { %2381 = vrot.lane.b32.xlu0 %v2631_v57, %s2554_s10 }
 0x2da   :  { %v328_v58 = vpop.permute.xlu1 %327 }
 0x2db   :  { %v326_v59 = vpop.permute.xlu0 %325 }
 0x2dc   :  { %v2634_v60 = vpack.i.bf16 %v328_v58, %v326_v59 }
 0x2de   :  { %v332_v61 = vpop.permute.xlu1 %331  ;;  %2386 = vrot.lane.b32.xlu1 %v2634_v60, %s2554_s10 }
 0x2df   :  { %v330_v62 = vpop.permute.xlu0 %329 }
 0x2e0   :  { %v2637_v63 = vpack.i.bf16 %v332_v61, %v330_v62 }
 0x2e2   :  { %v336_v0 = vpop.permute.xlu1 %335  ;;  %2391 = vrot.lane.b32.xlu0 %v2637_v63, %s2554_s10 }
 0x2e3   :  { %v334_v1 = vpop.permute.xlu0 %333 }
 0x2e4   :  { %v2640_v2 = vpack.i.bf16 %v336_v0, %v334_v1 }
 0x2e6   :  { %2396 = vrot.lane.b32.xlu1 %v2640_v2, %s2554_s10 }
 0x2e7   :  { %v2382_v3 = vpop.permute.xlu0 %2381 }
 0x2e8   :  { %v2384_v4 = vunpack.i.h.bf16 %v2382_v3  ;;  %v2383_v5 = vunpack.i.l.bf16 %v2382_v3 }
 0x2ea   :  { %v2283_v7 = vpack.c.bf16 %v2384_v4, %v2383_v5 }
 0x2ec   :  { %2285 = vmatprep.subr.msk.bf16.mxu1 %vm2645_vm7, %v2283_v7 }
 0x2ed   :  { %2288 = vmatpush3.bf16.xpose.msk.msra.mxu1 %vm2645_vm7, %v2283_v7 }
 0x2f4   :  { %2127 = vmatmul.mubr.msk.f32.vlgmr.msra.gmra.mrb[2].mxu1 %vm351_vm6, %v320_v54 }
 0x2f5   :  { %2133 = vmatprep.mubr.msk.f32.mxu1 %vm351_vm6, %v326_v59 }
 0x350   :  { %v2387_v8 = vpop.permute.xlu1 %2386 }
 0x351   :  { %v2389_v9 = vunpack.i.h.bf16 %v2387_v8  ;;  %v2388_v10 = vunpack.i.l.bf16 %v2387_v8 }
 0x353   :  { %v2289_v11 = vpack.c.bf16 %v2389_v9, %v2388_v10 }
 0x354   :  { %v2392_v12 = vpop.permute.xlu0 %2391 }
 0x355   :  { %v2394_v13 = vunpack.i.h.bf16 %v2392_v12  ;;  %v2393_v14 = vunpack.i.l.bf16 %v2392_v12  ;;  %2291 = vmatprep.subr.msk.bf16.mxu1 %vm2645_vm7, %v2289_v11 }
 0x356   :  { %2294 = vmatpush3.bf16.xpose.msk.msra.mxu1 %vm2645_vm7, %v2289_v11 }
 0x357   :  { %v2295_v15 = vpack.c.bf16 %v2394_v13, %v2393_v14 }
 0x358   :  { %v2397_v16 = vpop.permute.xlu1 %2396 }
 0x359   :  { %v2399_v18 = vunpack.i.h.bf16 %v2397_v16  ;;  %v2398_v19 = vunpack.i.l.bf16 %v2397_v16  ;;  %2297 = vmatprep.subr.msk.bf16.mxu1 %vm2645_vm7, %v2295_v15 }
 0x35b   :  { %v2301_v20 = vpack.c.bf16 %v2399_v18, %v2398_v19 }
 0x35d   :  { %2134 = vmatmul.mubr.msk.f32.vlgmr.msra.gmra.mrb[4].mxu1 %vm351_vm6, %v328_v58 }
 0x35e   :  { %2300 = vmatpush3.bf16.xpose.msk.msra.mxu1 %vm2645_vm7, %v2295_v15  ;;  %2140 = vmatprep.mubr.msk.f32.mxu1 %vm351_vm6, %v330_v62 }
 0x35f   :  { %2303 = vmatprep.subr.msk.bf16.mxu1 %vm2645_vm7, %v2301_v20 }
 0x365   :  { %2141 = vmatmul.mubr.msk.f32.vlgmr.msra.gmra.mrb[6].mxu1 %vm351_vm6, %v332_v61 }
 0x366   :  { %2306 = vmatpush3.bf16.xpose.msk.msra.mxu1 %vm2645_vm7, %v2301_v20  ;;  %2147 = vmatprep.mubr.msk.f32.mxu1 %vm351_vm6, %v334_v1 }
 0x36d   :  { %2148 = vmatmul.mubr.msk.f32.vlgmr.msra.gmra.mrb[8].mxu1 %vm351_vm6, %v336_v0 }
 0x3c7   :  { %v2128_v25 = vpop.f32.mrb[2].mxu1 }
 0x3c8   :  { %v697_v28 = vmul.f32 0.35355338, %v2128_v25  ;;  %v426_v29 = vpop.f32.mrb[3].mxu1 }
 0x3c9   :  { %v696_v31 = vmul.f32 0.35355338, %v426_v29 }
 0x3ca   :  { %v705_v32 = vadd.f32 %v697_v28, %v346_v27 }
 0x3cb   :  { %v704_v33 = vadd.f32 %v696_v31, %v345_v30 }
 0x3cc   :  { %v715_v34 = vsel %vm76_vm0, %v705_v32, -inf }
 0x3cd   :  { %716 = vmax.xlane.f32.xlu1 %v715_v34  ;;  %v712_v35 = vsel %vm76_vm0, %v704_v33, -inf }
 0x3ce   :  { %713 = vmax.xlane.f32.xlu0 %v712_v35 }
 0x430   :  { %v2135_v17 = vpop.f32.mrb[4].mxu1 }
 0x431   :  { %v513_v36 = vpop.f32.mrb[5].mxu1  ;;  %v699_v37 = vmul.f32 0.35355338, %v2135_v17 }
 0x432   :  { %v698_v38 = vmul.f32 0.35355338, %v513_v36 }
 0x433   :  { %v707_v41 = vadd.f32 %v699_v37, %v346_v27 }
 0x434   :  { %v706_v39 = vadd.f32 %v698_v38, %v345_v30 }
 0x435   :  { %v721_v46 = vsel %vm76_vm0, %v707_v41, -inf }
 0x436   :  { %v718_v40 = vsel %vm76_vm0, %v706_v39, -inf }
 0x437   :  { %719 = vmax.xlane.f32.xlu0 %v718_v40 }
 0x438   :  { %v2142_v42 = vpop.f32.mrb[6].mxu1 }
 0x439   :  { %v701_v43 = vmul.f32 0.35355338, %v2142_v42  ;;  %v600_v44 = vpop.f32.mrb[7].mxu1 }
 0x43a   :  { %v700_v45 = vmul.f32 0.35355338, %v600_v44 }
 0x43b   :  { %722 = vmax.xlane.f32.xlu0 %v721_v46  ;;  %v709_v50 = vadd.f32 %v701_v43, %v346_v27 }
 0x43c   :  { %v708_v52 = vadd.f32 %v700_v45, %v345_v30 }
 0x43d   :  { %v727_v53 = vsel %vm76_vm0, %v709_v50, -inf }
 0x43e   :  { %v724_v54 = vsel %vm76_vm0, %v708_v52, -inf }
 0x43f   :  { %728 = vmax.xlane.f32.xlu0 %v727_v53  ;;  %725 = vmax.xlane.f32.xlu1 %v724_v54 }
 0x440   :  { %v2149_v55 = vpop.f32.mrb[8].mxu1 }
 0x441   :  { %v703_v56 = vmul.f32 0.35355338, %v2149_v55  ;;  %v687_v58 = vpop.f32.mrb[9].mxu1 }
 0x442   :  { %v702_v59 = vmul.f32 0.35355338, %v687_v58 }
 0x443   :  { %v711_v61 = vadd.f32 %v703_v56, %v346_v27 }
 0x444   :  { %v710_v62 = vadd.f32 %v702_v59, %v345_v30 }
 0x445   :  { %v733_v0 = vsel %vm76_vm0, %v711_v61, -inf }
 0x446   :  { %734 = vmax.xlane.f32.xlu0 %v733_v0  ;;  %v730_v1 = vsel %vm76_vm0, %v710_v62, -inf }
 0x447   :  { %731 = vmax.xlane.f32.xlu1 %v730_v1 }
 0x458   :  { %2401 = vrot.lane.b32.xlu1 %v2631_v57, %s2556_s11 }
 0x45a   :  { %v717_v3 = vpop.xlane.xlu1 %716 }
 0x45b   :  { %v737_v4 = vsub.f32 %v705_v32, %v717_v3  ;;  %v714_v6 = vpop.xlane.xlu0 %713 }
 0x45c   :  { %v736_v7 = vsub.f32 %v704_v33, %v714_v6 }
 0x45d   :  { %v746_v5 = vmul.f32 1.442695, %v737_v4 }
 0x45e   :  { %v744_v9 = vmul.f32 1.442695, %v736_v7 }
 0x45f   :  { %2420 = vpow2.f32 %v746_v5 }
 0x460   :  { %2422 = vpow2.f32 %v744_v9  ;;  %v1148_v9 = vld [vmem:[#allocation2 + $0x20] sm:$0xff] }
 0x469   :  { %v2421_v8 = vpop.eup %2420 }
 0x46a   :  { %v763_v10 = vsel %vm76_vm0, %v2421_v8, 0.0  ;;  %v2686_v11 = vpop.eup %2422 }
 0x46b   :  { %764 = vadd.xlane.f32.xlu0 %v763_v10  ;;  %v760_v12 = vsel %vm76_vm0, %v2686_v11, 0.0 }
 0x47c   :  { %761 = vadd.xlane.f32.xlu1 %v760_v12 }
 0x4c4   :  { %v720_v13 = vpop.xlane.xlu0 %719 }
 0x4c5   :  { %v738_v57 = vsub.f32 %v706_v39, %v720_v13 }
 0x4c7   :  { %v748_v14 = vmul.f32 1.442695, %v738_v57 }
 0x4c8   :  { %v723_v15 = vpop.xlane.xlu0 %722 }
 0x4c9   :  { %2424 = vpow2.f32 %v748_v14  ;;  %v739_v16 = vsub.f32 %v707_v41, %v723_v15 }
 0x4cb   :  { %v750_v18 = vmul.f32 1.442695, %v739_v16 }
 0x4cc   :  { %v729_v19 = vpop.xlane.xlu0 %728  ;;  %v726_v20 = vpop.xlane.xlu1 %725 }
 0x4cd   :  { %2426 = vpow2.f32 %v750_v18  ;;  %v741_v21 = vsub.f32 %v709_v50, %v729_v19  ;;  %v740_v22 = vsub.f32 %v708_v52, %v726_v20 }
 0x4cf   :  { %v754_v23 = vmul.f32 1.442695, %v741_v21  ;;  %v752_v24 = vmul.f32 1.442695, %v740_v22 }
 0x4d1   :  { %2428 = vpow2.f32 %v754_v23 }
 0x4d2   :  { %2430 = vpow2.f32 %v752_v24 }
 0x4d3   :  { %v2425_v25 = vpop.eup %2424  ;;  %v735_v26 = vpop.xlane.xlu0 %734 }
 0x4d4   :  { %v743_v27 = vsub.f32 %v711_v61, %v735_v26  ;;  %v732_v28 = vpop.xlane.xlu1 %731  ;;  %v766_v29 = vsel %vm76_vm0, %v2425_v25, 0.0 }
 0x4d5   :  { %v742_v30 = vsub.f32 %v710_v62, %v732_v28  ;;  %767 = vadd.xlane.f32.xlu1 %v766_v29 }
 0x4d6   :  { %v758_v31 = vmul.f32 1.442695, %v743_v27 }
 0x4d7   :  { %v2427_v32 = vpop.eup %2426  ;;  %v756_v33 = vmul.f32 1.442695, %v742_v30 }
 0x4d8   :  { %2432 = vpow2.f32 %v758_v31  ;;  %v2402_v34 = vpop.permute.xlu1 %2401  ;;  %v769_v35 = vsel %vm76_vm0, %v2427_v32, 0.0 }
 0x4d9   :  { %v2404_v17 = vunpack.i.h.bf16 %v2402_v34  ;;  %v2403_v36 = vunpack.i.l.bf16 %v2402_v34  ;;  %770 = vadd.xlane.f32.xlu0 %v769_v35  ;;  %2434 = vpow2.f32 %v756_v33  ;;  %v1150_v35 = vld [vmem:[#allocation2 + $0x30] sm:$0xff] }
 0x4db   :  { %v2429_v37 = vpop.eup %2428  ;;  %v2307_v38 = vpack.c.bf16 %v2404_v17, %v2403_v36 }
 0x4dc   :  { %v2692_v39 = vpop.eup %2430  ;;  %v775_v40 = vsel %vm76_vm0, %v2429_v37, 0.0 }
 0x4dd   :  { %776 = vadd.xlane.f32.xlu0 %v775_v40  ;;  %v772_v41 = vsel %vm76_vm0, %v2692_v39, 0.0  ;;  %2308 = vmatprep.subr.bf16.mxu0 %v2307_v38 }
 0x4de   :  { %773 = vadd.xlane.f32.xlu1 %v772_v41  ;;  %2310 = vmatpush3.bf16.msra.mxu0 %v2307_v38 }
 0x4e2   :  { %v2697_v42 = vpop.eup %2432 }
 0x4e3   :  { %v781_v43 = vsel %vm76_vm0, %v2697_v42, 0.0  ;;  %v2701_v44 = vpop.eup %2434 }
 0x4e4   :  { %782 = vadd.xlane.f32.xlu0 %v781_v43  ;;  %v778_v45 = vsel %vm76_vm0, %v2701_v44, 0.0 }
 0x4e8   :  { %779 = vadd.xlane.f32.xlu0 %v778_v45 }
 0x4ef   :  { %2411 = vrot.lane.b32.xlu1 %v2637_v63, %s2556_s11 }
 0x4f3   :  { %2416 = vrot.lane.b32.xlu1 %v2640_v2, %s2556_s11 }
 0x4f8   :  { %v765_v46 = vpop.xlane.xlu0 %764 }
 0x4f9   :  { %2436 = vrcp.f32 %v765_v46 }
 0x4fe   :  { %2406 = vrot.lane.b32.xlu0 %v2634_v60, %s2556_s11 }
 0x503   :  { %v2437_v50 = vpop.eup %2436 }
 0x504   :  { %v787_v52 = vmul.f32 %v2437_v50, %v2421_v8 }
 0x506   :  { %v1483_v53 = vsel %vm76_vm0, %v787_v52, 0.0 }
 0x507   :  { %1491 = vst [vmem:[#allocation6 + $0x8] sm:$0xff] %v1483_v53 }
 0x509   :  { %v762_v54 = vpop.xlane.xlu1 %761 }
 0x50a   :  { %2438 = vrcp.f32 %v762_v54 }
 0x514   :  { %v2439_v55 = vpop.eup %2438 }
 0x515   :  { %v785_v56 = vmul.f32 %v2439_v55, %v2686_v11 }
 0x517   :  { %2154 = vmatprep.mubr.msk.f32.mxu0 %vm76_vm0, %v785_v56  ;;  %v1482_v63 = vsel %vm76_vm0, %v785_v56, 0.0 }
 0x518   :  { %1490 = vst [vmem:[#allocation6] sm:$0xff] %v1482_v63  ;;  %2155 = vmatmul.mubr.msk.f32.vlgmr.msra.gmra.mrb[2].mxu0 %vm76_vm0, %v787_v52 }
 0x562   :  { %v768_v2 = vpop.xlane.xlu1 %767 }
 0x563   :  { %2440 = vrcp.f32 %v768_v2 }
 0x566   :  { %v771_v60 = vpop.xlane.xlu0 %770 }
 0x567   :  { %2442 = vrcp.f32 %v771_v60 }
 0x56a   :  { %v777_v58 = vpop.xlane.xlu0 %776 }
 0x56b   :  { %2444 = vrcp.f32 %v777_v58  ;;  %v774_v59 = vpop.xlane.xlu1 %773 }
 0x56c   :  { %2446 = vrcp.f32 %v774_v59 }
 0x56d   :  { %v2441_v61 = vpop.eup %2440 }
 0x56e   :  { %v789_v62 = vmul.f32 %v2441_v61, %v2425_v25 }
 0x56f   :  { %v2412_v0 = vpop.permute.xlu1 %2411 }
 0x570   :  { %v2414_v1 = vunpack.i.h.bf16 %v2412_v0  ;;  %v2413_v3 = vunpack.i.l.bf16 %v2412_v0  ;;  %2161 = vmatprep.mubr.msk.f32.mxu0 %vm76_vm0, %v789_v62  ;;  %v1484_v4 = vsel %vm76_vm0, %v789_v62, 0.0  ;;  %v1545_v0 = vld [vmem:[#allocation2 + $0x40] sm:$0xff] }
 0x571   :  { %v2443_v5 = vpop.eup %2442  ;;  %1492 = vst [vmem:[#allocation6 + $0x10] sm:$0xff] %v1484_v4  ;;  %v783_v6 = vpop.xlane.xlu0 %782  ;;  %v1547_v4 = vld [vmem:[#allocation2 + $0x50] sm:$0xff] }
 0x572   :  { %v791_v7 = vmul.f32 %v2443_v5, %v2427_v32  ;;  %v2315_v8 = vpack.c.bf16 %v2414_v1, %v2413_v3  ;;  %2448 = vrcp.f32 %v783_v6  ;;  %v1149_v32 = vld [vmem:[#allocation2 + $0x28] sm:$0xff]  ;;  %v1548_v5 = vld [vmem:[#allocation2 + $0x58] sm:$0xff] }
 0x573   :  { %v2417_v14 = vpop.permute.xlu1 %2416  ;;  %v1546_v1 = vld [vmem:[#allocation2 + $0x48] sm:$0xff]  ;;  %v2327_v6 = vpack.c.bf16 %v1548_v5, %v1547_v4 }
 0x574   :  { %v1485_v10 = vsel %vm76_vm0, %v791_v7, 0.0  ;;  %2316 = vmatprep.subr.bf16.mxu1 %v2315_v8  ;;  %v2419_v20 = vunpack.i.h.bf16 %v2417_v14  ;;  %v2418_v21 = vunpack.i.l.bf16 %v2417_v14  ;;  %v2323_v3 = vpack.c.bf16 %v1546_v1, %v1545_v0 }
 0x575   :  { %v2445_v11 = vpop.eup %2444  ;;  %1493 = vst [vmem:[#allocation6 + $0x18] sm:$0xff] %v1485_v10  ;;  %2318 = vmatpush3.bf16.msra.mxu1 %v2315_v8  ;;  %v780_v12 = vpop.xlane.xlu0 %779 }
 0x576   :  { %v2447_v13 = vpop.eup %2446  ;;  %v795_v57 = vmul.f32 %v2445_v11, %v2429_v37  ;;  %2450 = vrcp.f32 %v780_v12  ;;  %2178 = vmatprep.subr.mxu1 %v1148_v9  ;;  %v2319_v27 = vpack.c.bf16 %v2419_v20, %v2418_v21 }
 0x577   :  { %v793_v15 = vmul.f32 %v2447_v13, %v2692_v39  ;;  %v1151_v39 = vld [vmem:[#allocation2 + $0x38] sm:$0xff]  ;;  %v1535_v13 = vsub.s32 4, %v2621_v49 }
 0x578   :  { %v1487_v16 = vsel %vm76_vm0, %v795_v57, 0.0 }
 0x579   :  { %1495 = vst [vmem:[#allocation6 + $0x28] sm:$0xff] %v1487_v16  ;;  %2168 = vmatprep.mubr.msk.f32.mxu1 %vm76_vm0, %v793_v15  ;;  %v1486_v18 = vsel %vm76_vm0, %v793_v15, 0.0  ;;  %v2407_v19 = vpop.permute.xlu0 %2406  ;;  %v1536_v14 = vrot.slane %v2627_v51, %v1535_v13 }
 0x57a   :  { %1494 = vst [vmem:[#allocation6 + $0x20] sm:$0xff] %v1486_v18  ;;  %v2409_v22 = vunpack.i.h.bf16 %v2407_v19  ;;  %v2408_v23 = vunpack.i.l.bf16 %v2407_v19  ;;  %2169 = vmatmul.mubr.msk.f32.vlgmr.msra.gmra.mrb[10].mxu1 %vm76_vm0, %v795_v57  ;;  %v1541_v57 = vsub.s32 5, %v2621_v49 }
 0x57b   :  { %2179 = vmatpush3.msra.mxu1 %v1148_v9 }
 0x57c   :  { %v2449_v24 = vpop.eup %2448  ;;  %v2311_v25 = vpack.c.bf16 %v2409_v22, %v2408_v23  ;;  %2183 = vmatprep.subr.mxu1 %v1149_v32  ;;  %v1542_v20 = vrot.slane %v2627_v51, %v1541_v57 }
 0x57d   :  { %v799_v26 = vmul.f32 %v2449_v24, %v2697_v42  ;;  %v1502_v42 = vsub.s32 1, %v2621_v49 }
 0x57e   :  { %2312 = vmatprep.subr.bf16.mxu0 %v2311_v25 }
 0x57f   :  { %v1489_v28 = vsel %vm76_vm0, %v799_v26, 0.0  ;;  %2314 = vmatpush3.bf16.msra.mxu0 %v2311_v25  ;;  %v1503_v43 = vrot.slane %v2627_v51, %v1502_v42  ;;  %v1652_v25 = vld [vmem:[#allocation2 + $0x60] sm:$0xff] }
 0x580   :  { %v2451_v29 = vpop.eup %2450  ;;  %1497 = vst [vmem:[#allocation6 + $0x38] sm:$0xff] %v1489_v28  ;;  %2320 = vmatprep.subr.bf16.mxu0 %v2319_v27  ;;  %v1654_v28 = vld [vmem:[#allocation2 + $0x70] sm:$0xff] }
 0x581   :  { %v797_v30 = vmul.f32 %v2451_v29, %v2701_v44  ;;  %v1655_v29 = vld [vmem:[#allocation2 + $0x78] sm:$0xff] }
 0x582   :  { %2162 = vmatmul.mubr.msk.f32.vlgmr.msra.gmra.mrb[4].mxu0 %vm76_vm0, %v791_v7 }
 0x583   :  { %2322 = vmatpush3.bf16.msra.mxu0 %v2319_v27  ;;  %2175 = vmatprep.mubr.msk.f32.mxu0 %vm76_vm0, %v797_v30  ;;  %v1488_v31 = vsel %vm76_vm0, %v797_v30, 0.0  ;;  %v2335_v30 = vpack.c.bf16 %v1655_v29, %v1654_v28 }
 0x584   :  { %1496 = vst [vmem:[#allocation6 + $0x30] sm:$0xff] %v1488_v31  ;;  %2324 = vmatprep.subr.bf16.mxu0 %v2323_v3  ;;  %v1656_v31 = vld [vmem:[#allocation2 + $0x80] sm:$0xff] }
 0x586   :  { %2176 = vmatmul.mubr.msk.f32.vlgmr.msra.gmra.mrb[6].mxu0 %vm76_vm0, %v799_v26  ;;  %v1653_v26 = vld [vmem:[#allocation2 + $0x68] sm:$0xff] }
 0x587   :  { %2326 = vmatpush3.bf16.msra.mxu0 %v2323_v3  ;;  %v2331_v27 = vpack.c.bf16 %v1653_v26, %v1652_v25 }
 0x588   :  { %2328 = vmatprep.subr.bf16.mxu0 %v2327_v6 }
 0x58b   :  { %2330 = vmatpush3.bf16.msra.mxu0 %v2327_v6 }
 0x58c   :  { %2332 = vmatprep.subr.bf16.mxu0 %v2331_v27 }
 0x5eb   :  { %v2156_v33 = vpop.f32.mrb[2].mxu0 }
 0x5ec   :  { %v878_v34 = vpop.f32.mrb[3].mxu0 }
 0x5ed   :  { %2180 = vmatprep.mubr.msk.f32.mxu1 %vm351_vm6, %v878_v34  ;;  %v1658_v34 = vld [vmem:[#allocation2 + $0x90] sm:$0xff] }
 0x5ee   :  { %2181 = vmatmul.mubr.msk.f32.vlgmr.msra.gmra.mrb[12].mxu1 %vm351_vm6, %v2156_v33 }
 0x5ef   :  { %2184 = vmatpush3.msra.mxu1 %v1149_v32  ;;  %v1657_v32 = vld [vmem:[#allocation2 + $0x88] sm:$0xff] }
 0x5f0   :  { %2188 = vmatprep.subr.mxu1 %v1150_v35  ;;  %v2339_v33 = vpack.c.bf16 %v1657_v32, %v1656_v31  ;;  %v1776_v31 = vsub.s32 6, %v2621_v49  ;;  %v1782_v32 = vsub.s32 7, %v2621_v49 }
 0x64d   :  { %v2170_v17 = vpop.f32.mrb[10].mxu1 }
 0x64e   :  { %v1052_v36 = vpop.f32.mrb[11].mxu1 }
 0x655   :  { %v2163_v37 = vpop.f32.mrb[4].mxu0 }
 0x656   :  { %v965_v38 = vpop.f32.mrb[5].mxu0 }
 0x657   :  { %2185 = vmatprep.mubr.msk.f32.mxu1 %vm351_vm6, %v965_v38 }
 0x658   :  { %2186 = vmatmul.mubr.msk.f32.vlgmr.msra.gmra.mrb[12].mxu1 %vm351_vm6, %v2163_v37 }
 0x659   :  { %v2177_v40 = vpop.f32.mrb[6].mxu0  ;;  %2189 = vmatpush3.msra.mxu1 %v1150_v35  ;;  %2190 = vmatprep.mubr.msk.f32.mxu1 %vm351_vm6, %v1052_v36  ;;  %v1659_v35 = vld [vmem:[#allocation2 + $0x98] sm:$0xff]  ;;  %v1551_v36 = vsub.s32 2, %v2621_v49 }
 0x65a   :  { %v1139_v41 = vpop.f32.mrb[7].mxu0  ;;  %2193 = vmatprep.subr.mxu1 %v1151_v39 }
 0x65b   :  { %v1552_v37 = vrot.slane %v2627_v51, %v1551_v36 }
 0x660   :  { %2191 = vmatmul.mubr.msk.f32.vlgmr.msra.gmra.mrb[12].mxu1 %vm351_vm6, %v2170_v17  ;;  %v2343_v17 = vpack.c.bf16 %v1659_v35, %v1658_v34 }
 0x661   :  { %2194 = vmatpush3.msra.mxu1 %v1151_v39  ;;  %2195 = vmatprep.mubr.msk.f32.mxu1 %vm351_vm6, %v1139_v41 }
 0x668   :  { %2196 = vmatmul.mubr.msk.f32.vlgmr.msra.gmra.mrb[12].mxu1 %vm351_vm6, %v2177_v40 }
 0x73b   :  { %v2197_v44 = vpop.f32.mrb[12].mxu1 }
 0x73c   :  { %v1499_v45 = vadd.f32 %v2197_v44, %v2613_v47  ;;  %v1467_v46 = vpop.f32.mrb[13].mxu1 }
 0x73d   :  { %v1498_v50 = vadd.f32 %v1467_v46, %v2615_v48 }
 0x73e   :  { %v1505_v52 = vadd.f32 %v1503_v43, %v1499_v45 }
 0x73f   :  { %v1504_v53 = vadd.f32 %v1503_v43, %v1498_v50 }
 0x740   :  { %v1509_v54 = vsel %vm241_vm5, %v1505_v52, 0.0 }
 0x741   :  { %1510 = vadd.xlane.f32.xlu0 %v1509_v54  ;;  %v1506_v55 = vsel %vm241_vm5, %v1504_v53, 0.0 }
 0x742   :  { %1507 = vadd.xlane.f32.xlu1 %v1506_v55 }
 0x7ce   :  { %v1511_v56 = vpop.xlane.xlu0 %1510 }
 0x7cf   :  { %v1514_v63 = vmul.f32 0.03125, %v1511_v56  ;;  %v1508_v2 = vpop.xlane.xlu1 %1507 }
 0x7d0   :  { %v1513_v60 = vmul.f32 0.03125, %v1508_v2 }
 0x7d1   :  { %v1516_v58 = vsub.f32 %v1505_v52, %v1514_v63 }
 0x7d2   :  { %v1515_v59 = vsub.f32 %v1504_v53, %v1513_v60 }
 0x7d3   :  { %v1518_v61 = vmul.f32 %v1516_v58, %v1516_v58 }
 0x7d4   :  { %v1517_v62 = vmul.f32 %v1515_v59, %v1515_v59 }
 0x7d5   :  { %v1522_v47 = vsel %vm241_vm5, %v1518_v61, 0.0 }
 0x7d6   :  { %1523 = vadd.xlane.f32.xlu0 %v1522_v47  ;;  %v1519_v48 = vsel %vm241_vm5, %v1517_v62, 0.0  ;;  %v1662_v47 = vsub.s32 3, %v2621_v49  ;;  %v1972_v49 = vld [vmem:[%s2802_s2 + $0x8] ss:$0 sm:$0xff]  ;;  %s1914_s2 = sshll.u32 %s2557_s14, 4  ;;  %s1915_s2 = int_to_ptr.vmem [resolvable:$true] %s1914_s2 }
 0x7d7   :  { %1520 = vadd.xlane.f32.xlu1 %v1519_v48  ;;  %s2494_s15 = scalar_lea.vmem %s1915_s2, 1024  ;;  %p2499_p9 = scmp.lt.s32.totalorder %s1915_s2, %s1915_s2 }
 0x7d8   :  { %v1663_v48 = vrot.slane %v2627_v51, %v1662_v47  ;;  %p2495_p8 = scmp.ne.s32.totalorder %s1915_s2, %s2494_s15  ;;  %p2500_p10 = scmp.lt.s32.totalorder %s2494_s15, %s2494_s15 }
 0x7da   :  { %p2501_p11 = por %p2500_p10, %p2499_p9 }
 0x7dc   :  { %p2502_p12 = pnand %p2501_p11, %p2495_p8 }
 0x863   :  { %v1524_v7 = vpop.xlane.xlu0 %1523 }
 0x864   :  { %v1526_v8 = vmul.f32 0.03125, %v1524_v7  ;;  %v1521_v9 = vpop.xlane.xlu1 %1520 }
 0x865   :  { %v1525_v10 = vmul.f32 0.03125, %v1521_v9 }
 0x866   :  { %v1528_v11 = vadd.f32 1e-12, %v1526_v8 }
 0x867   :  { %v1527_v12 = vadd.f32 1e-12, %v1525_v10 }
 0x868   :  { %2452 = vrsqrt.f32 %v1528_v11 }
 0x869   :  { %2454 = vrsqrt.f32 %v1527_v12 }
 0x872   :  { %v2453_v15 = vpop.eup %2452 }
 0x873   :  { %v2455_v16 = vpop.eup %2454  ;;  %v1532_v18 = vmul.f32 %v2453_v15, %v1516_v58 }
 0x874   :  { %v1531_v19 = vmul.f32 %v2455_v16, %v1515_v59 }
 0x875   :  { %v1538_v21 = vmul.f32 %v1536_v14, %v1532_v18 }
 0x876   :  { %v1537_v22 = vmul.f32 %v1536_v14, %v1531_v19  ;;  %v1786_v19 = vld [vmem:[#allocation2 + $0xa0] sm:$0xff] }
 0x877   :  { %v1544_v24 = vadd.f32 %v1542_v20, %v1538_v21 }
 0x878   :  { %v1543_v23 = vadd.f32 %v1542_v20, %v1537_v22  ;;  %v1787_v20 = vld [vmem:[#allocation2 + $0xa8] sm:$0xff]  ;;  %v1788_v22 = vld [vmem:[#allocation2 + $0xb0] sm:$0xff] }
 0x879   :  { %v2347_v21 = vpack.c.bf16 %v1787_v20, %v1786_v19 }
 0x87a   :  { %2206 = vmatprep.mubr.msk.f32.mxu0 %vm241_vm5, %v1543_v23 }
 0x87b   :  { %2207 = vmatmul.mubr.msk.f32.vlgmr.msra.gmra.mrb[8].mxu0 %vm241_vm5, %v1544_v24  ;;  %2348 = vmatprep.subr.bf16.mxu1 %v2347_v21 }
 0x87c   :  { %2334 = vmatpush3.bf16.msra.mxu0 %v2331_v27  ;;  %2350 = vmatpush3.bf16.msra.mxu1 %v2347_v21 }
 0x87d   :  { %2336 = vmatprep.subr.bf16.mxu0 %v2335_v30 }
 0x880   :  { %2338 = vmatpush3.bf16.msra.mxu0 %v2335_v30 }
 0x881   :  { %2340 = vmatprep.subr.bf16.mxu0 %v2339_v33 }
 0x884   :  { %2342 = vmatpush3.bf16.msra.mxu0 %v2339_v33  ;;  %v1777_v33 = vrot.slane %v2627_v51, %v1776_v31 }
 0x885   :  { %2344 = vmatprep.subr.bf16.mxu0 %v2343_v17 }
 0x888   :  { %2346 = vmatpush3.bf16.msra.mxu0 %v2343_v17 }
 0x94e   :  { %v2208_v38 = vpop.f32.mrb[8].mxu0 }
 0x94f   :  { %v1631_v39 = vadd.f32 %v2208_v38, %v1552_v37  ;;  %v1625_v40 = vpop.f32.mrb[9].mxu0 }
 0x950   :  { %v1626_v41 = vadd.f32 %v1625_v40, %v1552_v37  ;;  %v1783_v37 = vrot.slane %v2627_v51, %v1782_v32 }
 0x951   :  { %v1635_v42 = vmul.f32 %v1631_v39, %v1631_v39 }
 0x952   :  { %v1634_v43 = vmul.f32 %v1626_v41, %v1626_v41 }
 0x953   :  { %v1637_v44 = vmul.f32 %v1635_v42, %v1631_v39 }
 0x954   :  { %v1636_v45 = vmul.f32 %v1634_v43, %v1626_v41 }
 0x955   :  { %v1639_v46 = vmul.f32 0.044715, %v1637_v44 }
 0x956   :  { %v1638_v50 = vmul.f32 0.044715, %v1636_v45 }
 0x957   :  { %v1641_v52 = vadd.f32 %v1639_v46, %v1631_v39 }
 0x958   :  { %v1640_v53 = vadd.f32 %v1638_v50, %v1626_v41 }
 0x959   :  { %v1643_v54 = vmul.f32 0.7978846, %v1641_v52 }
 0x95a   :  { %v1642_v55 = vmul.f32 0.7978846, %v1640_v53 }
 0x95b   :  { %2456 = vtanh.f32 %v1643_v54 }
 0x95c   :  { %2458 = vtanh.f32 %v1642_v55 }
 0x965   :  { %v2457_v56 = vpop.eup %2456 }
 0x966   :  { %v2459_v63 = vpop.eup %2458  ;;  %v1647_v2 = vadd.f32 1.0, %v2457_v56 }
 0x967   :  { %v1646_v60 = vadd.f32 1.0, %v2459_v63 }
 0x968   :  { %v1649_v58 = vmul.f32 0.5, %v1647_v2 }
 0x969   :  { %v1648_v59 = vmul.f32 0.5, %v1646_v60 }
 0x96a   :  { %v1651_v62 = vmul.f32 %v1649_v58, %v1631_v39 }
 0x96b   :  { %v1650_v61 = vmul.f32 %v1648_v59, %v1626_v41 }
 0x96d   :  { %2225 = vmatprep.mubr.msk.f32.mxu0 %vm1664_vm10, %v1650_v61 }
 0x96e   :  { %2226 = vmatmul.mubr.msk.f32.vlgmr.msra.gmra.mrb[10].mxu0 %vm1664_vm10, %v1651_v62 }
 0xa41   :  { %v2227_v0 = vpop.f32.mrb[10].mxu0 }
 0xa42   :  { %v1743_v1 = vadd.f32 %v2227_v0, %v1663_v48  ;;  %v1737_v3 = vpop.f32.mrb[11].mxu0 }
 0xa43   :  { %v1738_v4 = vadd.f32 %v1737_v3, %v1663_v48 }
 0xa44   :  { %v1747_v5 = vadd.f32 %v1743_v1, %v1544_v24 }
 0xa45   :  { %v1746_v6 = vadd.f32 %v1738_v4, %v1543_v23  ;;  %v1789_v23 = vld [vmem:[#allocation2 + $0xb8] sm:$0xff] }
 0xa46   :  { %v1751_v7 = vsel %vm241_vm5, %v1747_v5, 0.0  ;;  %v2351_v24 = vpack.c.bf16 %v1789_v23, %v1788_v22 }
 0xa47   :  { %1752 = vadd.xlane.f32.xlu0 %v1751_v7  ;;  %v1748_v8 = vsel %vm241_vm5, %v1746_v6, 0.0 }
 0xa48   :  { %1749 = vadd.xlane.f32.xlu1 %v1748_v8  ;;  %2352 = vmatprep.subr.bf16.mxu1 %v2351_v24 }
 0xa49   :  { %2354 = vmatpush3.bf16.msra.mxu1 %v2351_v24 }
 0xad4   :  { %v1753_v9 = vpop.xlane.xlu0 %1752 }
 0xad5   :  { %v1755_v10 = vmul.f32 0.03125, %v1753_v9  ;;  %v1750_v11 = vpop.xlane.xlu1 %1749 }
 0xad6   :  { %v1754_v12 = vmul.f32 0.03125, %v1750_v11 }
 0xad7   :  { %v1757_v13 = vsub.f32 %v1747_v5, %v1755_v10 }
 0xad8   :  { %v1756_v57 = vsub.f32 %v1746_v6, %v1754_v12 }
 0xad9   :  { %v1759_v14 = vmul.f32 %v1757_v13, %v1757_v13 }
 0xada   :  { %v1758_v15 = vmul.f32 %v1756_v57, %v1756_v57 }
 0xadb   :  { %v1763_v16 = vsel %vm241_vm5, %v1759_v14, 0.0 }
 0xadc   :  { %1764 = vadd.xlane.f32.xlu0 %v1763_v16  ;;  %v1760_v18 = vsel %vm241_vm5, %v1758_v15, 0.0 }
 0xadd   :  { %1761 = vadd.xlane.f32.xlu1 %v1760_v18 }
 0xb69   :  { %v1765_v25 = vpop.xlane.xlu0 %1764 }
 0xb6a   :  { %v1767_v26 = vmul.f32 0.03125, %v1765_v25  ;;  %v1762_v27 = vpop.xlane.xlu1 %1761 }
 0xb6b   :  { %v1766_v28 = vmul.f32 0.03125, %v1762_v27 }
 0xb6c   :  { %v1769_v29 = vadd.f32 1e-12, %v1767_v26 }
 0xb6d   :  { %v1768_v30 = vadd.f32 1e-12, %v1766_v28 }
 0xb6e   :  { %2460 = vrsqrt.f32 %v1769_v29 }
 0xb6f   :  { %2462 = vrsqrt.f32 %v1768_v30 }
 0xb78   :  { %v2461_v34 = vpop.eup %2460 }
 0xb79   :  { %v2463_v35 = vpop.eup %2462  ;;  %v1773_v17 = vmul.f32 %v2461_v34, %v1757_v13 }
 0xb7a   :  { %v1772_v36 = vmul.f32 %v2463_v35, %v1756_v57 }
 0xb7b   :  { %v1779_v38 = vmul.f32 %v1777_v33, %v1773_v17 }
 0xb7c   :  { %v1778_v39 = vmul.f32 %v1777_v33, %v1772_v36 }
 0xb7d   :  { %v1785_v41 = vadd.f32 %v1783_v37, %v1779_v38 }
 0xb7e   :  { %v1784_v40 = vadd.f32 %v1783_v37, %v1778_v39 }
 0xb80   :  { %2236 = vmatprep.mubr.msk.f32.mxu1 %vm241_vm5, %v1784_v40 }
 0xb81   :  { %2237 = vmatmul.mubr.msk.f32.vlgmr.msra.gmra.mrb[14].mxu1 %vm241_vm5, %v1785_v41 }
 0xc54   :  { %v2238_v42 = vpop.f32.mrb[14].mxu1 }
 0xc55   :  { %v1872_v43 = vadd.f32 %v2238_v42, %v1972_v49  ;;  %v1866_v44 = vpop.f32.mrb[15].mxu1 }
 0xc56   :  { %v1867_v45 = vadd.f32 %v1972_v49, %v1866_v44 }
 0xc57   :  { %1877 = vmax.xlane.f32.xlu0 %v1872_v43 }
 0xc58   :  { %1875 = vmax.xlane.f32.xlu1 %v1867_v45 }
 0xce4   :  { %v1878_v46 = vpop.xlane.xlu0 %1877 }
 0xce5   :  { %v1880_v51 = vsub.f32 %v1872_v43, %v1878_v46  ;;  %v1876_v50 = vpop.xlane.xlu1 %1875 }
 0xce6   :  { %v1879_v52 = vsub.f32 %v1867_v45, %v1876_v50 }
 0xce7   :  { %v1883_v53 = vmul.f32 1.442695, %v1880_v51 }
 0xce8   :  { %v1881_v54 = vmul.f32 1.442695, %v1879_v52 }
 0xce9   :  { %2464 = vpow2.f32 %v1883_v53 }
 0xcea   :  { %2466 = vpow2.f32 %v1881_v54 }
 0xcf3   :  { %v2465_v55 = vpop.eup %2464 }
 0xcf4   :  { %v2467_v56 = vpop.eup %2466  ;;  %1887 = vadd.xlane.f32.xlu0 %v2465_v55 }
 0xcf5   :  { %1885 = vadd.xlane.f32.xlu1 %v2467_v56 }
 0xcf6   :  { %2505 = shalt.err (!%p2502_p12)
}
 0xcf7   :  { %s2506_s18 = scalar_lea.hbm %s2804_s4, 1024 }
 0xcf8   :  { %p2507_p13 = scmp.ne.s32.totalorder %s2804_s4, %s2506_s18  ;;  %p2510_p0 = scmp.lt.u32.totalorder %s2506_s18, %s2804_s4 }
 0xcfa   :  { %p2512_p1 = pnand %p2510_p0, %p2507_p13 }
 0xcfc   :  { %2515 = shalt.err (!%p2512_p1)
}
 0xcfd   :  { %1920 = dma.vmem_to_hbm [thread:$0]  %s1915_s2, 1024, %s2804_s4, [#allocation7], %s2545_s25, %s2545_s25, %s2546_s26  }
 0xcfe   :  { %s2558_s27 = smov [#allocation5]  }
 0xcff   :  { %s1902_s28 = sshll.u32 %s2558_s27, 4  ;;  %s1903_s28 = int_to_ptr.vmem [resolvable:$true] %s1902_s28 }
 0xd00   :  { %s2516_s29 = scalar_lea.vmem %s1903_s28, 256  ;;  %p2521_p3 = scmp.lt.s32.totalorder %s1903_s28, %s1903_s28 }
 0xd01   :  { %p2517_p2 = scmp.ne.s32.totalorder %s1903_s28, %s2516_s29  ;;  %p2522_p4 = scmp.lt.s32.totalorder %s2516_s29, %s2516_s29 }
 0xd03   :  { %p2523_p5 = por %p2522_p4, %p2521_p3 }
 0xd05   :  { %p2524_p6 = pnand %p2523_p5, %p2517_p2 }
 0xd81   :  { %v1888_v63 = vpop.xlane.xlu0 %1887 }
 0xd82   :  { %2468 = vlog2.f32 %v1888_v63  ;;  %v1886_v2 = vpop.xlane.xlu1 %1885 }
 0xd83   :  { %2470 = vlog2.f32 %v1886_v2 }
 0xd8c   :  { %v2469_v60 = vpop.eup %2468 }
 0xd8d   :  { %v2471_v58 = vpop.eup %2470  ;;  %v1892_v59 = vmul.f32 0.6931472, %v2469_v60 }
 0xd8e   :  { %v1890_v61 = vmul.f32 0.6931472, %v2471_v58 }
 0xd8f   :  { %v1894_v62 = vsub.f32 %v1880_v51, %v1892_v59 }
 0xd90   :  { %v1893_v47 = vsub.f32 %v1879_v52, %v1890_v61 }
 0xd91   :  { %1896 = vst [vmem:[#allocation5 + $0x8] sm:$0xff] %v1894_v62 }
 0xd92   :  { %1895 = vst [vmem:[#allocation5] sm:$0xff] %v1893_v47 }
 0xd93   :  { %2527 = shalt.err (!%p2524_p6)
}
 0xd94   :  { %s2528_s5 = scalar_lea.hbm %s2803_s3, 256 }
 0xd95   :  { %p2529_p7 = scmp.ne.s32.totalorder %s2803_s3, %s2528_s5  ;;  %p2532_p8 = scmp.lt.u32.totalorder %s2528_s5, %s2803_s3 }
 0xd97   :  { %p2534_p9 = pnand %p2532_p8, %p2529_p7 }
 0xd99   :  { %2537 = shalt.err (!%p2534_p9)
}
 0xd9a   :  { %1908 = dma.vmem_to_hbm [thread:$0]  %s1903_s28, 256, %s2803_s3, [#allocation4], %s2545_s25, %s2545_s25, %s2546_s26  }
 0xd9b   :  { %2540 = dma.done.wait [#allocation4], 256  }
 0xd9c   :  { %2541 = vsyncadd [#allocation4], 4294967040 }
 0xd9d   :  { %2542 = dma.done.wait [#allocation7], 1024  }
 0xd9e   :  { %2543 = vsyncadd [#allocation7], 4294966272 }
 0xd9f   :  { %1927 = vsyncpa [#allocation3], 1 }
 0xda0   :  { %1928 = vsyncpa [#allocation4], 1 }
 0xda1   :  { %1929 = vsyncpa [#allocation7], 1 }

</bundles_post_ra>
